<compile_context>
chip_gen: v5e
topology: v5e:2x2
jax: 0.10.0
libtpu: 0.0.40
codegen_flags: <defaults>
</compile_context>

<pallas_src>
import jax
import jax.numpy as jnp
from jax import lax
from jax.experimental import pallas as pl
from jax.experimental.pallas import tpu as pltpu


def _lstm_conditioner_kernel(x_ref, len_ref,
                             wih_ref, whh_ref, b_ref,
                             wlf_ref, wlb_ref, blin_ref,
                             out_ref,
                             xp_ref):
    T, TB, E = x_ref.shape
    H = whh_ref.shape[0] // 2          # whh_ref is the fused (2H, 8H) block-diag
    H4 = 4 * H

    # ---- hoisted input projection: one fat bf16 MXU matmul, f32 accumulate ----
    x2d = x_ref[...].reshape(T * TB, E)                                # bf16
    proj = (jnp.dot(x2d, wih_ref[...], preferred_element_type=jnp.float32)
            + b_ref[...])                                              # (T*TB, 8H) f32
    xp_ref[...] = proj.reshape(T, TB, 2 * H4)                          # single store pass

    whh_cat = whh_ref[...]                                             # (2H, 8H)

    # Hoist the length broadcast out of the unrolled loop (no per-step
    # broadcast_in_dim; JAX does not CSE it).
    lens_bH = jnp.broadcast_to(len_ref[...], (TB, H))                  # int32 (TB, H)
    bwd_start_bH = T - lens_bH                                         # bwd valid iff t >= T-len

    def gates(g, c):
        # sigmoid(x) = 0.5*(tanh(0.5*x)+1): one EUP pass per gate.
        i = 0.5 * (jnp.tanh(0.5 * g[:, 0:H]) + 1.0)
        f = 0.5 * (jnp.tanh(0.5 * g[:, H:2 * H]) + 1.0)
        gg = jnp.tanh(g[:, 2 * H:3 * H])
        o = 0.5 * (jnp.tanh(0.5 * g[:, 3 * H:4 * H]) + 1.0)
        c_new = f * c + i * gg
        h_new = o * jnp.tanh(c_new)
        return h_new, c_new

    zeros = jnp.zeros((TB, H), jnp.float32)

    def body(t, carry):
        h_f, c_f, h_b, c_b = carry
        tb = T - 1 - t

        # One block-diagonal recurrent matmul feeds both directions.
        hcat = jnp.concatenate([h_f, h_b], axis=1)                     # (TB, 2H)
        gcat = jnp.dot(hcat, whh_cat,
                       preferred_element_type=jnp.float32)             # (TB, 8H)
        g_f = xp_ref[t, :, :H4] + gcat[:, :H4]
        g_b = xp_ref[tb, :, H4:] + gcat[:, H4:]

        hf_new, cf_new = gates(g_f, c_f)
        hb_new, cb_new = gates(g_b, c_b)

        valid_f = t < lens_bH                                          # (TB, H) bool
        valid_b = t >= bwd_start_bH                                    # i.e. (T-1-t) < len
        h_f = jnp.where(valid_f, hf_new, h_f)
        c_f = jnp.where(valid_f, cf_new, c_f)
        h_b = jnp.where(valid_b, hb_new, h_b)
        c_b = jnp.where(valid_b, cb_new, c_b)
        return h_f, c_f, h_b, c_b

    # Full unroll for short T (LLO scheduler visibility); partial unroll for
    # long T to bound vreg pressure of the unrolled body.
    unroll = True if T <= 16 else 2
    h_f, _, h_b, _ = lax.fori_loop(0, T, body, (zeros, zeros, zeros, zeros),
                                   unroll=unroll)

    # FeedForward: Linear(2H -> OUT) + Tanh; concat replaced by two summed dots.
    out = jnp.tanh(jnp.dot(h_f, wlf_ref[...], preferred_element_type=jnp.float32)
                   + jnp.dot(h_b, wlb_ref[...], preferred_element_type=jnp.float32)
                   + blin_ref[...])
    out_ref[...] = out.astype(out_ref.dtype)


def _vmem_plan():
    """(vmem_limit_bytes, block-budget bytes) derived from the chip's VMEM."""
    cap = 64 * 1024 * 1024                        # v7x per-TC physical VMEM (safe floor)
    try:
        cap = int(pltpu.get_tpu_info().vmem_capacity_bytes)
    except Exception:
        pass
    limit = min(int(cap * 0.75), 100 * 1024 * 1024)   # ~48 MiB on v7x, ~96 MiB on v5e/v6e
    budget = int(limit * 0.85)                        # headroom for compiler temporaries
    return limit, budget


def _pick_batch_tile(Bp, T, E, H, OUT, budget_bytes):
    """Largest multiple-of-8 batch tile dividing Bp that fits the VMEM budget
    and the vreg-pressure cap, with >= 2 grid steps when Bp >= 16 (megacore)."""
    H4 = 4 * H
    # TB-independent VMEM (weights, double-buffered by the default pipeline).
    weight_bytes = 2 * (E * 2 * H4 * 2          # w_ih (bf16)
                        + 2 * H * 2 * H4 * 4    # fused w_hh (f32)
                        + 2 * H4 * 4            # fused bias
                        + 2 * H * OUT * 4       # two linear halves
                        + OUT * 4)              # b_lin
    # Per-batch-row VMEM.
    per_row = (2 * T * E * 2                    # x block, double-buffered, bf16
               + T * 2 * H4 * 4                 # pre-activation scratch (single buffer)
               + 2 * OUT * 4                    # out block, double-buffered
               + 16 * H * 4)                    # loop live values headroom
    tb_budget = max(8, (budget_bytes - weight_bytes) // per_row)
    tb_vreg = max(8, 8192 // max(H, 1))         # 4 carries * TB * H * 4B <= ~128 KiB
    tb_cap = max(8, (min(128, tb_budget, tb_vreg) // 8) * 8)
    if Bp >= 16:                                # keep >= 2 grid steps for v7x megacore
        tb_cap = min(tb_cap, max(8, ((Bp // 2) // 8) * 8))
    if Bp <= tb_cap:
        return Bp
    for tb in range(tb_cap, 7, -8):
        if Bp % tb == 0:
            return tb
    return 8


def lstm_conditioner_forward(inputs, masks, params, *, batch_tile=None):
    """inputs: (B, T) int32 token ids, masks: (B, T) {0,1} contiguous-prefix masks."""
    emb = params["embedding"]
    B, T = inputs.shape
    E = emb.shape[1]
    H = params["w_hh_f"].shape[0]
    OUT = params["w_lin_f"].shape[1]
    H4 = 4 * H

    # Pad the batch to a multiple of 8 (sublane granularity); padded rows get
    # token 0 / length 0 and are sliced off at the end.
    pad = (-B) % 8
    if pad:
        inputs = jnp.pad(inputs, ((0, pad), (0, 0)))
        masks = jnp.pad(masks, ((0, pad), (0, 0)))
    Bp = B + pad

    # Embedding gather straight into time-major bf16 (halves x DMA bytes).
    x_tm = jnp.take(emb, inputs.T, axis=0).astype(jnp.bfloat16)         # (T, Bp, E)
    # Packed-sequence semantics: per-example valid-prefix length.
    lens = masks.astype(jnp.int32).sum(axis=1, keepdims=True)           # (Bp, 1)

    w_ih = params["w_ih"].astype(jnp.bfloat16)                          # (E, 8H)
    # Block-diagonal fused recurrent weight: one MXU dot per step for both dirs.
    whh_cat = jnp.zeros((2 * H, 2 * H4), jnp.float32)
    whh_cat = whh_cat.at[:H, :H4].set(params["w_hh_f"])
    whh_cat = whh_cat.at[H:, H4:].set(params["w_hh_b"])

    vmem_limit, budget = _vmem_plan()
    TB = batch_tile if batch_tile is not None else _pick_batch_tile(Bp, T, E, H, OUT, budget)
    assert Bp % TB == 0
    grid = (Bp // TB,)

    kernel = pl.pallas_call(
        _lstm_conditioner_kernel,
        out_shape=jax.ShapeDtypeStruct((Bp, OUT), jnp.float32),
        grid=grid,
        in_specs=[
            pl.BlockSpec((T, TB, E), lambda b: (0, b, 0)),      # x (time-major, bf16)
            pl.BlockSpec((TB, 1), lambda b: (b, 0)),            # lengths
            pl.BlockSpec((E, 2 * H4), lambda b: (0, 0)),        # fused w_ih (bf16, fwd||bwd)
            pl.BlockSpec((2 * H, 2 * H4), lambda b: (0, 0)),    # block-diag w_hh
            pl.BlockSpec((1, 2 * H4), lambda b: (0, 0)),        # fused bias (b_ih+b_hh)
            pl.BlockSpec((H, OUT), lambda b: (0, 0)),           # w_lin forward half
            pl.BlockSpec((H, OUT), lambda b: (0, 0)),           # w_lin backward half
            pl.BlockSpec((1, OUT), lambda b: (0, 0)),           # b_lin
        ],
        out_specs=pl.BlockSpec((TB, OUT), lambda b: (b, 0)),
        scratch_shapes=[pltpu.VMEM((T, TB, 2 * H4), jnp.float32)],   # fused pre-acts
        compiler_params=pltpu.CompilerParams(
            dimension_semantics=("parallel",),
            vmem_limit_bytes=vmem_limit),
    )
    out = kernel(x_tm, lens, w_ih, whh_cat, params["b"],
                 params["w_lin_f"], params["w_lin_b"], params["b_lin"])
    return out[:B] if pad else out


def init_params(key, vocab_dim, embedding_dim, hidden_dim, output_dim):
    ks = jax.random.split(key, 9)

    def u(k, shape, scale):
        return jax.random.uniform(k, shape, jnp.float32, -scale, scale)

    emb = jax.random.normal(ks[0], (vocab_dim, embedding_dim), jnp.float32)
    emb = emb.at[0].set(0.0)                      # padding_idx = 0

    s = 1.0 / (hidden_dim ** 0.5)
    s_lin = 1.0 / ((2 * hidden_dim) ** 0.5)
    H4 = 4 * hidden_dim
    params = {
        "embedding": emb,
        # Fused input weights: columns [0:4H] = forward gates (i,f,g,o),
        # columns [4H:8H] = backward gates (i,f,g,o). (PyTorch weight_ih_l0 /
        # weight_ih_l0_reverse, transposed & concatenated.)
        "w_ih": u(ks[1], (embedding_dim, 2 * H4), s),
        "w_hh_f": u(ks[2], (hidden_dim, H4), s),
        "w_hh_b": u(ks[3], (hidden_dim, H4), s),
        # b_ih + b_hh already summed, fwd || bwd.
        "b": u(ks[4], (1, 2 * H4), s) + u(ks[5], (1, 2 * H4), s),
        # FeedForward Linear(2H -> OUT): split into the two direction halves.
        "w_lin_f": u(ks[6], (hidden_dim, output_dim), s_lin),
        "w_lin_b": u(ks[7], (hidden_dim, output_dim), s_lin),
        "b_lin": u(ks[8], (1, output_dim), s_lin),
    }
    return params


def _reference(inputs, masks, params):
    """Pure-JAX reference (masked bidirectional LSTM final states -> linear+tanh)."""
    emb = params["embedding"]
    x = jnp.take(emb, inputs, axis=0).astype(jnp.float32)     # (B, T, E)
    m = masks.astype(jnp.float32)
    B, T = inputs.shape
    H = params["w_hh_f"].shape[0]
    H4 = 4 * H
    w_ih, b = params["w_ih"], params["b"]
    hi = jax.lax.Precision.HIGHEST

    def run(col, whh, time_order):
        h = jnp.zeros((B, H), jnp.float32)
        c = jnp.zeros((B, H), jnp.float32)
        for t in time_order:
            pre = (jnp.dot(x[:, t, :], w_ih[:, col], precision=hi) + b[:, col]
                   + jnp.dot(h, whh, precision=hi))
            i = jax.nn.sigmoid(pre[:, :H])
            f = jax.nn.sigmoid(pre[:, H:2 * H])
            g = jnp.tanh(pre[:, 2 * H:3 * H])
            o = jax.nn.sigmoid(pre[:, 3 * H:])
            c_new = f * c + i * g
            h_new = o * jnp.tanh(c_new)
            mt = m[:, t:t + 1]
            h = mt * h_new + (1.0 - mt) * h
            c = mt * c_new + (1.0 - mt) * c
        return h

    h_f = run(slice(0, H4), params["w_hh_f"], range(T))
    h_b = run(slice(H4, 2 * H4), params["w_hh_b"], range(T - 1, -1, -1))
    return jnp.tanh(jnp.dot(h_f, params["w_lin_f"], precision=hi)
                    + jnp.dot(h_b, params["w_lin_b"], precision=hi)
                    + params["b_lin"])


if __name__ == "__main__":
    # Small, module-consistent shapes.
    VOCAB, E, H, OUT = 100, 32, 32, 64
    B, T = 2, 8

    key = jax.random.PRNGKey(0)
    k_tok, k_param = jax.random.split(key)

    params = init_params(k_param, VOCAB, E, H, OUT)

    inputs = jax.random.randint(k_tok, (B, T), 1, VOCAB, dtype=jnp.int32)
    # Variable-length sequences: lengths (8, 5); pad with token 0 + mask 0.
    lengths = jnp.array([T, 5], dtype=jnp.int32)
    masks = (jnp.arange(T)[None, :] < lengths[:, None]).astype(jnp.int32)
    inputs = inputs * masks                        # padded positions -> padding_idx 0

    out = lstm_conditioner_forward(inputs, masks, params)
    out = jax.block_until_ready(out)
    assert out.shape == (B, OUT)

    ref = jax.block_until_ready(_reference(inputs, masks, params))
    assert bool(jnp.all(jnp.isfinite(out)))
    # Tolerance widened (knowingly) vs the all-f32 version: the input
    # projection feeds bf16 operands to the MXU (f32 accumulation).
    assert bool(jnp.allclose(out, ref, atol=1.5e-2, rtol=1.5e-2))

    print("KERNEL_OK")
</pallas_src>

<mosaic_0001>
module attributes {stable_mosaic.version = 11 : i64} {
  func.func @_lstm_conditioner_kernel(%arg0: i32, %arg1: memref<8x8x32xbf16, #tpu.memory_space<vmem>>, %arg2: memref<8x1xi32, #tpu.memory_space<vmem>>, %arg3: memref<32x256xbf16, #tpu.memory_space<vmem>>, %arg4: memref<64x256xf32, #tpu.memory_space<vmem>>, %arg5: memref<1x256xf32, #tpu.memory_space<vmem>>, %arg6: memref<32x64xf32, #tpu.memory_space<vmem>>, %arg7: memref<32x64xf32, #tpu.memory_space<vmem>>, %arg8: memref<1x64xf32, #tpu.memory_space<vmem>>, %arg9: memref<8x64xf32, #tpu.memory_space<vmem>>, %arg10: memref<8x8x256xf32, #tpu.memory_space<vmem>>) attributes {dimension_semantics = [#tpu.dimension_semantics<parallel>], iteration_bounds = array<i64: 1>, scalar_prefetch = 0 : i64, scratch_operands = 1 : i64, tpu.core_type = #tpu.core_type<tc>, window_params = [{transform_indices = @transform_0, window_bounds = array<i64: 8, 8, 32>}, {transform_indices = @transform_1, window_bounds = array<i64: 8, 1>}, {pipeline_mode = #tpu.pipeline_mode<synchronous>, transform_indices = @transform_2, window_bounds = array<i64: 32, 256>}, {pipeline_mode = #tpu.pipeline_mode<synchronous>, transform_indices = @transform_3, window_bounds = array<i64: 64, 256>}, {pipeline_mode = #tpu.pipeline_mode<synchronous>, transform_indices = @transform_4, window_bounds = array<i64: 1, 256>}, {pipeline_mode = #tpu.pipeline_mode<synchronous>, transform_indices = @transform_5, window_bounds = array<i64: 32, 64>}, {pipeline_mode = #tpu.pipeline_mode<synchronous>, transform_indices = @transform_6, window_bounds = array<i64: 32, 64>}, {pipeline_mode = #tpu.pipeline_mode<synchronous>, transform_indices = @transform_7, window_bounds = array<i64: 1, 64>}, {transform_indices = @transform_8, window_bounds = array<i64: 8, 64>}]} {
    %c0 = arith.constant 0 : index
    %c0_0 = arith.constant 0 : index
    %c0_1 = arith.constant 0 : index
    %0 = vector.load %arg1[%c0, %c0_0, %c0_1] : memref<8x8x32xbf16, #tpu.memory_space<vmem>>, vector<8x8x32xbf16>
    %1 = vector.shape_cast %0 : vector<8x8x32xbf16> to vector<64x32xbf16>
    %c0_2 = arith.constant 0 : index
    %c0_3 = arith.constant 0 : index
    %2 = vector.load %arg3[%c0_2, %c0_3] : memref<32x256xbf16, #tpu.memory_space<vmem>>, vector<32x256xbf16>
    %cst = arith.constant dense<0.000000e+00> : vector<64x256xf32>
    %3 = tpu.matmul %1, %2, %cst {dimension_numbers = #tpu.dot_dimension_numbers<[1], [0], [0], [1], [0, 0, 1, 1], [], []>} : vector<64x32xbf16>, vector<32x256xbf16>, vector<64x256xf32> -> vector<64x256xf32>
    %c0_4 = arith.constant 0 : index
    %c0_5 = arith.constant 0 : index
    %4 = vector.load %arg5[%c0_4, %c0_5] : memref<1x256xf32, #tpu.memory_space<vmem>>, vector<1x256xf32>
    %5 = vector.broadcast %4 : vector<1x256xf32> to vector<64x256xf32>
    %6 = arith.addf %3, %5 : vector<64x256xf32>
    %7 = vector.shape_cast %6 : vector<64x256xf32> to vector<8x8x256xf32>
    %c0_6 = arith.constant 0 : index
    %c0_7 = arith.constant 0 : index
    %c0_8 = arith.constant 0 : index
    %8 = vector.load %arg10[%c0_6, %c0_7, %c0_8] : memref<8x8x256xf32, #tpu.memory_space<vmem>>, vector<8x8x256xf32>
    tpu.vector_store %arg10[%c0_6, %c0_7, %c0_8], %7 {strides = array<i32>} : memref<8x8x256xf32, #tpu.memory_space<vmem>>, vector<8x8x256xf32>,
    %c0_9 = arith.constant 0 : index
    %c0_10 = arith.constant 0 : index
    %9 = vector.load %arg4[%c0_9, %c0_10] : memref<64x256xf32, #tpu.memory_space<vmem>>, vector<64x256xf32>
    %c0_11 = arith.constant 0 : index
    %c0_12 = arith.constant 0 : index
    %10 = vector.load %arg2[%c0_11, %c0_12] : memref<8x1xi32, #tpu.memory_space<vmem>>, vector<8x1xi32>
    %11 = vector.shape_cast %10 : vector<8x1xi32> to vector<8x1xi32>
    %12 = vector.broadcast %11 : vector<8x1xi32> to vector<8x32xi32>
    %c8_i32 = arith.constant 8 : i32
    %13 = vector.broadcast %c8_i32 : i32 to vector<8x32xi32>
    %14 = arith.subi %13, %12 : vector<8x32xi32>
    %cst_13 = arith.constant 0.000000e+00 : f32
    %15 = vector.broadcast %cst_13 : f32 to vector<8x32xf32>
    %c0_i32 = arith.constant 0 : i32
    %c7_i32 = arith.constant 7 : i32
    %16 = arith.subi %c7_i32, %c0_i32 : i32
    %17 = tpu.concatenate %15, %15 in 1 : vector<8x32xf32>, vector<8x32xf32> -> vector<8x64xf32>
    %cst_14 = arith.constant dense<0.000000e+00> : vector<8x256xf32>
    %18 = tpu.matmul %17, %9, %cst_14 {dimension_numbers = #tpu.dot_dimension_numbers<[1], [0], [0], [1], [0, 0, 1, 1], [], []>} : vector<8x64xf32>, vector<64x256xf32>, vector<8x256xf32> -> vector<8x256xf32>
    %19 = arith.index_cast %c0_i32 : i32 to index
    %c0_15 = arith.constant 0 : index
    %c0_16 = arith.constant 0 : index
    %20 = vector.load %arg10[%19, %c0_15, %c0_16] : memref<8x8x256xf32, #tpu.memory_space<vmem>>, vector<1x8x128xf32>
    %21 = vector.shape_cast %20 : vector<1x8x128xf32> to vector<8x128xf32>
    %22 = vector.extract_strided_slice %18 {offsets = [0, 0], sizes = [8, 128], strides = [1, 1]} : vector<8x256xf32> to vector<8x128xf32>
    %23 = arith.addf %21, %22 : vector<8x128xf32>
    %24 = arith.index_cast %16 : i32 to index
    %c0_17 = arith.constant 0 : index
    %c128 = arith.constant 128 : index
    %25 = vector.load %arg10[%24, %c0_17, %c128] : memref<8x8x256xf32, #tpu.memory_space<vmem>>, vector<1x8x128xf32>
    %26 = vector.shape_cast %25 : vector<1x8x128xf32> to vector<8x128xf32>
    %27 = vector.extract_strided_slice %18 {offsets = [0, 128], sizes = [8, 128], strides = [1, 1]} : vector<8x256xf32> to vector<8x128xf32>
    %28 = arith.addf %26, %27 : vector<8x128xf32>
    %29 = vector.extract_strided_slice %23 {offsets = [0, 0], sizes = [8, 32], strides = [1, 1]} : vector<8x128xf32> to vector<8x32xf32>
    %cst_18 = arith.constant 5.000000e-01 : f32
    %30 = vector.broadcast %cst_18 : f32 to vector<8x32xf32>
    %31 = arith.mulf %30, %29 : vector<8x32xf32>
    %32 = math.tanh %31 : vector<8x32xf32>
    %cst_19 = arith.constant 1.000000e+00 : f32
    %33 = vector.broadcast %cst_19 : f32 to vector<8x32xf32>
    %34 = arith.addf %32, %33 : vector<8x32xf32>
    %cst_20 = arith.constant 5.000000e-01 : f32
    %35 = vector.broadcast %cst_20 : f32 to vector<8x32xf32>
    %36 = arith.mulf %35, %34 : vector<8x32xf32>
    %37 = vector.extract_strided_slice %23 {offsets = [0, 32], sizes = [8, 32], strides = [1, 1]} : vector<8x128xf32> to vector<8x32xf32>
    %cst_21 = arith.constant 5.000000e-01 : f32
    %38 = vector.broadcast %cst_21 : f32 to vector<8x32xf32>
    %39 = arith.mulf %38, %37 : vector<8x32xf32>
    %40 = math.tanh %39 : vector<8x32xf32>
    %cst_22 = arith.constant 1.000000e+00 : f32
    %41 = vector.broadcast %cst_22 : f32 to vector<8x32xf32>
    %42 = arith.addf %40, %41 : vector<8x32xf32>
    %cst_23 = arith.constant 5.000000e-01 : f32
    %43 = vector.broadcast %cst_23 : f32 to vector<8x32xf32>
    %44 = arith.mulf %43, %42 : vector<8x32xf32>
    %45 = vector.extract_strided_slice %23 {offsets = [0, 64], sizes = [8, 32], strides = [1, 1]} : vector<8x128xf32> to vector<8x32xf32>
    %46 = math.tanh %45 : vector<8x32xf32>
    %47 = vector.extract_strided_slice %23 {offsets = [0, 96], sizes = [8, 32], strides = [1, 1]} : vector<8x128xf32> to vector<8x32xf32>
    %cst_24 = arith.constant 5.000000e-01 : f32
    %48 = vector.broadcast %cst_24 : f32 to vector<8x32xf32>
    %49 = arith.mulf %48, %47 : vector<8x32xf32>
    %50 = math.tanh %49 : vector<8x32xf32>
    %cst_25 = arith.constant 1.000000e+00 : f32
    %51 = vector.broadcast %cst_25 : f32 to vector<8x32xf32>
    %52 = arith.addf %50, %51 : vector<8x32xf32>
    %cst_26 = arith.constant 5.000000e-01 : f32
    %53 = vector.broadcast %cst_26 : f32 to vector<8x32xf32>
    %54 = arith.mulf %53, %52 : vector<8x32xf32>
    %55 = arith.mulf %44, %15 : vector<8x32xf32>
    %56 = arith.mulf %36, %46 : vector<8x32xf32>
    %57 = arith.addf %55, %56 : vector<8x32xf32>
    %58 = math.tanh %57 : vector<8x32xf32>
    %59 = arith.mulf %54, %58 : vector<8x32xf32>
    %60 = vector.extract_strided_slice %28 {offsets = [0, 0], sizes = [8, 32], strides = [1, 1]} : vector<8x128xf32> to vector<8x32xf32>
    %cst_27 = arith.constant 5.000000e-01 : f32
    %61 = vector.broadcast %cst_27 : f32 to vector<8x32xf32>
    %62 = arith.mulf %61, %60 : vector<8x32xf32>
    %63 = math.tanh %62 : vector<8x32xf32>
    %cst_28 = arith.constant 1.000000e+00 : f32
    %64 = vector.broadcast %cst_28 : f32 to vector<8x32xf32>
    %65 = arith.addf %63, %64 : vector<8x32xf32>
    %cst_29 = arith.constant 5.000000e-01 : f32
    %66 = vector.broadcast %cst_29 : f32 to vector<8x32xf32>
    %67 = arith.mulf %66, %65 : vector<8x32xf32>
    %68 = vector.extract_strided_slice %28 {offsets = [0, 32], sizes = [8, 32], strides = [1, 1]} : vector<8x128xf32> to vector<8x32xf32>
    %cst_30 = arith.constant 5.000000e-01 : f32
    %69 = vector.broadcast %cst_30 : f32 to vector<8x32xf32>
    %70 = arith.mulf %69, %68 : vector<8x32xf32>
    %71 = math.tanh %70 : vector<8x32xf32>
    %cst_31 = arith.constant 1.000000e+00 : f32
    %72 = vector.broadcast %cst_31 : f32 to vector<8x32xf32>
    %73 = arith.addf %71, %72 : vector<8x32xf32>
    %cst_32 = arith.constant 5.000000e-01 : f32
    %74 = vector.broadcast %cst_32 : f32 to vector<8x32xf32>
    %75 = arith.mulf %74, %73 : vector<8x32xf32>
    %76 = vector.extract_strided_slice %28 {offsets = [0, 64], sizes = [8, 32], strides = [1, 1]} : vector<8x128xf32> to vector<8x32xf32>
    %77 = math.tanh %76 : vector<8x32xf32>
    %78 = vector.extract_strided_slice %28 {offsets = [0, 96], sizes = [8, 32], strides = [1, 1]} : vector<8x128xf32> to vector<8x32xf32>
    %cst_33 = arith.constant 5.000000e-01 : f32
    %79 = vector.broadcast %cst_33 : f32 to vector<8x32xf32>
    %80 = arith.mulf %79, %78 : vector<8x32xf32>
    %81 = math.tanh %80 : vector<8x32xf32>
    %cst_34 = arith.constant 1.000000e+00 : f32
    %82 = vector.broadcast %cst_34 : f32 to vector<8x32xf32>
    %83 = arith.addf %81, %82 : vector<8x32xf32>
    %cst_35 = arith.constant 5.000000e-01 : f32
    %84 = vector.broadcast %cst_35 : f32 to vector<8x32xf32>
    %85 = arith.mulf %84, %83 : vector<8x32xf32>
    %86 = arith.mulf %75, %15 : vector<8x32xf32>
    %87 = arith.mulf %67, %77 : vector<8x32xf32>
    %88 = arith.addf %86, %87 : vector<8x32xf32>
    %89 = math.tanh %88 : vector<8x32xf32>
    %90 = arith.mulf %85, %89 : vector<8x32xf32>
    %91 = vector.broadcast %c0_i32 : i32 to vector<8x32xi32>
    %92 = arith.cmpi slt, %91, %12 : vector<8x32xi32>
    %93 = vector.broadcast %c0_i32 : i32 to vector<8x32xi32>
    %94 = arith.cmpi sge, %93, %14 : vector<8x32xi32>
    %95 = arith.select %92, %59, %15 : vector<8x32xi1>, vector<8x32xf32>
    %96 = arith.select %92, %57, %15 : vector<8x32xi1>, vector<8x32xf32>
    %97 = arith.select %94, %90, %15 : vector<8x32xi1>, vector<8x32xf32>
    %98 = arith.select %94, %88, %15 : vector<8x32xi1>, vector<8x32xf32>
    %c1_i32 = arith.constant 1 : i32
    %c7_i32_36 = arith.constant 7 : i32
    %99 = arith.subi %c7_i32_36, %c1_i32 : i32
    %100 = tpu.concatenate %95, %97 in 1 : vector<8x32xf32>, vector<8x32xf32> -> vector<8x64xf32>
    %cst_37 = arith.constant dense<0.000000e+00> : vector<8x256xf32>
    %101 = tpu.matmul %100, %9, %cst_37 {dimension_numbers = #tpu.dot_dimension_numbers<[1], [0], [0], [1], [0, 0, 1, 1], [], []>} : vector<8x64xf32>, vector<64x256xf32>, vector<8x256xf32> -> vector<8x256xf32>
    %102 = arith.index_cast %c1_i32 : i32 to index
    %c0_38 = arith.constant 0 : index
    %c0_39 = arith.constant 0 : index
    %103 = vector.load %arg10[%102, %c0_38, %c0_39] : memref<8x8x256xf32, #tpu.memory_space<vmem>>, vector<1x8x128xf32>
    %104 = vector.shape_cast %103 : vector<1x8x128xf32> to vector<8x128xf32>
    %105 = vector.extract_strided_slice %101 {offsets = [0, 0], sizes = [8, 128], strides = [1, 1]} : vector<8x256xf32> to vector<8x128xf32>
    %106 = arith.addf %104, %105 : vector<8x128xf32>
    %107 = arith.index_cast %99 : i32 to index
    %c0_40 = arith.constant 0 : index
    %c128_41 = arith.constant 128 : index
    %108 = vector.load %arg10[%107, %c0_40, %c128_41] : memref<8x8x256xf32, #tpu.memory_space<vmem>>, vector<1x8x128xf32>
    %109 = vector.shape_cast %108 : vector<1x8x128xf32> to vector<8x128xf32>
    %110 = vector.extract_strided_slice %101 {offsets = [0, 128], sizes = [8, 128], strides = [1, 1]} : vector<8x256xf32> to vector<8x128xf32>
    %111 = arith.addf %109, %110 : vector<8x128xf32>
    %112 = vector.extract_strided_slice %106 {offsets = [0, 0], sizes = [8, 32], strides = [1, 1]} : vector<8x128xf32> to vector<8x32xf32>
    %cst_42 = arith.constant 5.000000e-01 : f32
    %113 = vector.broadcast %cst_42 : f32 to vector<8x32xf32>
    %114 = arith.mulf %113, %112 : vector<8x32xf32>
    %115 = math.tanh %114 : vector<8x32xf32>
    %cst_43 = arith.constant 1.000000e+00 : f32
    %116 = vector.broadcast %cst_43 : f32 to vector<8x32xf32>
    %117 = arith.addf %115, %116 : vector<8x32xf32>
    %cst_44 = arith.constant 5.000000e-01 : f32
    %118 = vector.broadcast %cst_44 : f32 to vector<8x32xf32>
    %119 = arith.mulf %118, %117 : vector<8x32xf32>
    %120 = vector.extract_strided_slice %106 {offsets = [0, 32], sizes = [8, 32], strides = [1, 1]} : vector<8x128xf32> to vector<8x32xf32>
    %cst_45 = arith.constant 5.000000e-01 : f32
    %121 = vector.broadcast %cst_45 : f32 to vector<8x32xf32>
    %122 = arith.mulf %121, %120 : vector<8x32xf32>
    %123 = math.tanh %122 : vector<8x32xf32>
    %cst_46 = arith.constant 1.000000e+00 : f32
    %124 = vector.broadcast %cst_46 : f32 to vector<8x32xf32>
    %125 = arith.addf %123, %124 : vector<8x32xf32>
    %cst_47 = arith.constant 5.000000e-01 : f32
    %126 = vector.broadcast %cst_47 : f32 to vector<8x32xf32>
    %127 = arith.mulf %126, %125 : vector<8x32xf32>
    %128 = vector.extract_strided_slice %106 {offsets = [0, 64], sizes = [8, 32], strides = [1, 1]} : vector<8x128xf32> to vector<8x32xf32>
    %129 = math.tanh %128 : vector<8x32xf32>
    %130 = vector.extract_strided_slice %106 {offsets = [0, 96], sizes = [8, 32], strides = [1, 1]} : vector<8x128xf32> to vector<8x32xf32>
    %cst_48 = arith.constant 5.000000e-01 : f32
    %131 = vector.broadcast %cst_48 : f32 to vector<8x32xf32>
    %132 = arith.mulf %131, %130 : vector<8x32xf32>
    %133 = math.tanh %132 : vector<8x32xf32>
    %cst_49 = arith.constant 1.000000e+00 : f32
    %134 = vector.broadcast %cst_49 : f32 to vector<8x32xf32>
    %135 = arith.addf %133, %134 : vector<8x32xf32>
    %cst_50 = arith.constant 5.000000e-01 : f32
    %136 = vector.broadcast %cst_50 : f32 to vector<8x32xf32>
    %137 = arith.mulf %136, %135 : vector<8x32xf32>
    %138 = arith.mulf %127, %96 : vector<8x32xf32>
    %139 = arith.mulf %119, %129 : vector<8x32xf32>
    %140 = arith.addf %138, %139 : vector<8x32xf32>
    %141 = math.tanh %140 : vector<8x32xf32>
    %142 = arith.mulf %137, %141 : vector<8x32xf32>
    %143 = vector.extract_strided_slice %111 {offsets = [0, 0], sizes = [8, 32], strides = [1, 1]} : vector<8x128xf32> to vector<8x32xf32>
    %cst_51 = arith.constant 5.000000e-01 : f32
    %144 = vector.broadcast %cst_51 : f32 to vector<8x32xf32>
    %145 = arith.mulf %144, %143 : vector<8x32xf32>
    %146 = math.tanh %145 : vector<8x32xf32>
    %cst_52 = arith.constant 1.000000e+00 : f32
    %147 = vector.broadcast %cst_52 : f32 to vector<8x32xf32>
    %148 = arith.addf %146, %147 : vector<8x32xf32>
    %cst_53 = arith.constant 5.000000e-01 : f32
    %149 = vector.broadcast %cst_53 : f32 to vector<8x32xf32>
    %150 = arith.mulf %149, %148 : vector<8x32xf32>
    %151 = vector.extract_strided_slice %111 {offsets = [0, 32], sizes = [8, 32], strides = [1, 1]} : vector<8x128xf32> to vector<8x32xf32>
    %cst_54 = arith.constant 5.000000e-01 : f32
    %152 = vector.broadcast %cst_54 : f32 to vector<8x32xf32>
    %153 = arith.mulf %152, %151 : vector<8x32xf32>
    %154 = math.tanh %153 : vector<8x32xf32>
    %cst_55 = arith.constant 1.000000e+00 : f32
    %155 = vector.broadcast %cst_55 : f32 to vector<8x32xf32>
    %156 = arith.addf %154, %155 : vector<8x32xf32>
    %cst_56 = arith.constant 5.000000e-01 : f32
    %157 = vector.broadcast %cst_56 : f32 to vector<8x32xf32>
    %158 = arith.mulf %157, %156 : vector<8x32xf32>
    %159 = vector.extract_strided_slice %111 {offsets = [0, 64], sizes = [8, 32], strides = [1, 1]} : vector<8x128xf32> to vector<8x32xf32>
    %160 = math.tanh %159 : vector<8x32xf32>
    %161 = vector.extract_strided_slice %111 {offsets = [0, 96], sizes = [8, 32], strides = [1, 1]} : vector<8x128xf32> to vector<8x32xf32>
    %cst_57 = arith.constant 5.000000e-01 : f32
    %162 = vector.broadcast %cst_57 : f32 to vector<8x32xf32>
    %163 = arith.mulf %162, %161 : vector<8x32xf32>
    %164 = math.tanh %163 : vector<8x32xf32>
    %cst_58 = arith.constant 1.000000e+00 : f32
    %165 = vector.broadcast %cst_58 : f32 to vector<8x32xf32>
    %166 = arith.addf %164, %165 : vector<8x32xf32>
    %cst_59 = arith.constant 5.000000e-01 : f32
    %167 = vector.broadcast %cst_59 : f32 to vector<8x32xf32>
    %168 = arith.mulf %167, %166 : vector<8x32xf32>
    %169 = arith.mulf %158, %98 : vector<8x32xf32>
    %170 = arith.mulf %150, %160 : vector<8x32xf32>
    %171 = arith.addf %169, %170 : vector<8x32xf32>
    %172 = math.tanh %171 : vector<8x32xf32>
    %173 = arith.mulf %168, %172 : vector<8x32xf32>
    %174 = vector.broadcast %c1_i32 : i32 to vector<8x32xi32>
    %175 = arith.cmpi slt, %174, %12 : vector<8x32xi32>
    %176 = vector.broadcast %c1_i32 : i32 to vector<8x32xi32>
    %177 = arith.cmpi sge, %176, %14 : vector<8x32xi32>
    %178 = arith.select %175, %142, %95 : vector<8x32xi1>, vector<8x32xf32>
    %179 = arith.select %175, %140, %96 : vector<8x32xi1>, vector<8x32xf32>
    %180 = arith.select %177, %173, %97 : vector<8x32xi1>, vector<8x32xf32>
    %181 = arith.select %177, %171, %98 : vector<8x32xi1>, vector<8x32xf32>
    %c2_i32 = arith.constant 2 : i32
    %c7_i32_60 = arith.constant 7 : i32
    %182 = arith.subi %c7_i32_60, %c2_i32 : i32
    %183 = tpu.concatenate %178, %180 in 1 : vector<8x32xf32>, vector<8x32xf32> -> vector<8x64xf32>
    %cst_61 = arith.constant dense<0.000000e+00> : vector<8x256xf32>
    %184 = tpu.matmul %183, %9, %cst_61 {dimension_numbers = #tpu.dot_dimension_numbers<[1], [0], [0], [1], [0, 0, 1, 1], [], []>} : vector<8x64xf32>, vector<64x256xf32>, vector<8x256xf32> -> vector<8x256xf32>
    %185 = arith.index_cast %c2_i32 : i32 to index
    %c0_62 = arith.constant 0 : index
    %c0_63 = arith.constant 0 : index
    %186 = vector.load %arg10[%185, %c0_62, %c0_63] : memref<8x8x256xf32, #tpu.memory_space<vmem>>, vector<1x8x128xf32>
    %187 = vector.shape_cast %186 : vector<1x8x128xf32> to vector<8x128xf32>
    %188 = vector.extract_strided_slice %184 {offsets = [0, 0], sizes = [8, 128], strides = [1, 1]} : vector<8x256xf32> to vector<8x128xf32>
    %189 = arith.addf %187, %188 : vector<8x128xf32>
    %190 = arith.index_cast %182 : i32 to index
    %c0_64 = arith.constant 0 : index
    %c128_65 = arith.constant 128 : index
    %191 = vector.load %arg10[%190, %c0_64, %c128_65] : memref<8x8x256xf32, #tpu.memory_space<vmem>>, vector<1x8x128xf32>
    %192 = vector.shape_cast %191 : vector<1x8x128xf32> to vector<8x128xf32>
    %193 = vector.extract_strided_slice %184 {offsets = [0, 128], sizes = [8, 128], strides = [1, 1]} : vector<8x256xf32> to vector<8x128xf32>
    %194 = arith.addf %192, %193 : vector<8x128xf32>
    %195 = vector.extract_strided_slice %189 {offsets = [0, 0], sizes = [8, 32], strides = [1, 1]} : vector<8x128xf32> to vector<8x32xf32>
    %cst_66 = arith.constant 5.000000e-01 : f32
    %196 = vector.broadcast %cst_66 : f32 to vector<8x32xf32>
    %197 = arith.mulf %196, %195 : vector<8x32xf32>
    %198 = math.tanh %197 : vector<8x32xf32>
    %cst_67 = arith.constant 1.000000e+00 : f32
    %199 = vector.broadcast %cst_67 : f32 to vector<8x32xf32>
    %200 = arith.addf %198, %199 : vector<8x32xf32>
    %cst_68 = arith.constant 5.000000e-01 : f32
    %201 = vector.broadcast %cst_68 : f32 to vector<8x32xf32>
    %202 = arith.mulf %201, %200 : vector<8x32xf32>
    %203 = vector.extract_strided_slice %189 {offsets = [0, 32], sizes = [8, 32], strides = [1, 1]} : vector<8x128xf32> to vector<8x32xf32>
    %cst_69 = arith.constant 5.000000e-01 : f32
    %204 = vector.broadcast %cst_69 : f32 to vector<8x32xf32>
    %205 = arith.mulf %204, %203 : vector<8x32xf32>
    %206 = math.tanh %205 : vector<8x32xf32>
    %cst_70 = arith.constant 1.000000e+00 : f32
    %207 = vector.broadcast %cst_70 : f32 to vector<8x32xf32>
    %208 = arith.addf %206, %207 : vector<8x32xf32>
    %cst_71 = arith.constant 5.000000e-01 : f32
    %209 = vector.broadcast %cst_71 : f32 to vector<8x32xf32>
    %210 = arith.mulf %209, %208 : vector<8x32xf32>
    %211 = vector.extract_strided_slice %189 {offsets = [0, 64], sizes = [8, 32], strides = [1, 1]} : vector<8x128xf32> to vector<8x32xf32>
    %212 = math.tanh %211 : vector<8x32xf32>
    %213 = vector.extract_strided_slice %189 {offsets = [0, 96], sizes = [8, 32], strides = [1, 1]} : vector<8x128xf32> to vector<8x32xf32>
    %cst_72 = arith.constant 5.000000e-01 : f32
    %214 = vector.broadcast %cst_72 : f32 to vector<8x32xf32>
    %215 = arith.mulf %214, %213 : vector<8x32xf32>
    %216 = math.tanh %215 : vector<8x32xf32>
    %cst_73 = arith.constant 1.000000e+00 : f32
    %217 = vector.broadcast %cst_73 : f32 to vector<8x32xf32>
    %218 = arith.addf %216, %217 : vector<8x32xf32>
    %cst_74 = arith.constant 5.000000e-01 : f32
    %219 = vector.broadcast %cst_74 : f32 to vector<8x32xf32>
    %220 = arith.mulf %219, %218 : vector<8x32xf32>
    %221 = arith.mulf %210, %179 : vector<8x32xf32>
    %222 = arith.mulf %202, %212 : vector<8x32xf32>
    %223 = arith.addf %221, %222 : vector<8x32xf32>
    %224 = math.tanh %223 : vector<8x32xf32>
    %225 = arith.mulf %220, %224 : vector<8x32xf32>
    %226 = vector.extract_strided_slice %194 {offsets = [0, 0], sizes = [8, 32], strides = [1, 1]} : vector<8x128xf32> to vector<8x32xf32>
    %cst_75 = arith.constant 5.000000e-01 : f32
    %227 = vector.broadcast %cst_75 : f32 to vector<8x32xf32>
    %228 = arith.mulf %227, %226 : vector<8x32xf32>
    %229 = math.tanh %228 : vector<8x32xf32>
    %cst_76 = arith.constant 1.000000e+00 : f32
    %230 = vector.broadcast %cst_76 : f32 to vector<8x32xf32>
    %231 = arith.addf %229, %230 : vector<8x32xf32>
    %cst_77 = arith.constant 5.000000e-01 : f32
    %232 = vector.broadcast %cst_77 : f32 to vector<8x32xf32>
    %233 = arith.mulf %232, %231 : vector<8x32xf32>
    %234 = vector.extract_strided_slice %194 {offsets = [0, 32], sizes = [8, 32], strides = [1, 1]} : vector<8x128xf32> to vector<8x32xf32>
    %cst_78 = arith.constant 5.000000e-01 : f32
    %235 = vector.broadcast %cst_78 : f32 to vector<8x32xf32>
    %236 = arith.mulf %235, %234 : vector<8x32xf32>
    %237 = math.tanh %236 : vector<8x32xf32>
    %cst_79 = arith.constant 1.000000e+00 : f32
    %238 = vector.broadcast %cst_79 : f32 to vector<8x32xf32>
    %239 = arith.addf %237, %238 : vector<8x32xf32>
    %cst_80 = arith.constant 5.000000e-01 : f32
    %240 = vector.broadcast %cst_80 : f32 to vector<8x32xf32>
    %241 = arith.mulf %240, %239 : vector<8x32xf32>
    %242 = vector.extract_strided_slice %194 {offsets = [0, 64], sizes = [8, 32], strides = [1, 1]} : vector<8x128xf32> to vector<8x32xf32>
    %243 = math.tanh %242 : vector<8x32xf32>
    %244 = vector.extract_strided_slice %194 {offsets = [0, 96], sizes = [8, 32], strides = [1, 1]} : vector<8x128xf32> to vector<8x32xf32>
    %cst_81 = arith.constant 5.000000e-01 : f32
    %245 = vector.broadcast %cst_81 : f32 to vector<8x32xf32>
    %246 = arith.mulf %245, %244 : vector<8x32xf32>
    %247 = math.tanh %246 : vector<8x32xf32>
    %cst_82 = arith.constant 1.000000e+00 : f32
    %248 = vector.broadcast %cst_82 : f32 to vector<8x32xf32>
    %249 = arith.addf %247, %248 : vector<8x32xf32>
    %cst_83 = arith.constant 5.000000e-01 : f32
    %250 = vector.broadcast %cst_83 : f32 to vector<8x32xf32>
    %251 = arith.mulf %250, %249 : vector<8x32xf32>
    %252 = arith.mulf %241, %181 : vector<8x32xf32>
    %253 = arith.mulf %233, %243 : vector<8x32xf32>
    %254 = arith.addf %252, %253 : vector<8x32xf32>
    %255 = math.tanh %254 : vector<8x32xf32>
    %256 = arith.mulf %251, %255 : vector<8x32xf32>
    %257 = vector.broadcast %c2_i32 : i32 to vector<8x32xi32>
    %258 = arith.cmpi slt, %257, %12 : vector<8x32xi32>
    %259 = vector.broadcast %c2_i32 : i32 to vector<8x32xi32>
    %260 = arith.cmpi sge, %259, %14 : vector<8x32xi32>
    %261 = arith.select %258, %225, %178 : vector<8x32xi1>, vector<8x32xf32>
    %262 = arith.select %258, %223, %179 : vector<8x32xi1>, vector<8x32xf32>
    %263 = arith.select %260, %256, %180 : vector<8x32xi1>, vector<8x32xf32>
    %264 = arith.select %260, %254, %181 : vector<8x32xi1>, vector<8x32xf32>
    %c3_i32 = arith.constant 3 : i32
    %c7_i32_84 = arith.constant 7 : i32
    %265 = arith.subi %c7_i32_84, %c3_i32 : i32
    %266 = tpu.concatenate %261, %263 in 1 : vector<8x32xf32>, vector<8x32xf32> -> vector<8x64xf32>
    %cst_85 = arith.constant dense<0.000000e+00> : vector<8x256xf32>
    %267 = tpu.matmul %266, %9, %cst_85 {dimension_numbers = #tpu.dot_dimension_numbers<[1], [0], [0], [1], [0, 0, 1, 1], [], []>} : vector<8x64xf32>, vector<64x256xf32>, vector<8x256xf32> -> vector<8x256xf32>
    %268 = arith.index_cast %c3_i32 : i32 to index
    %c0_86 = arith.constant 0 : index
    %c0_87 = arith.constant 0 : index
    %269 = vector.load %arg10[%268, %c0_86, %c0_87] : memref<8x8x256xf32, #tpu.memory_space<vmem>>, vector<1x8x128xf32>
    %270 = vector.shape_cast %269 : vector<1x8x128xf32> to vector<8x128xf32>
    %271 = vector.extract_strided_slice %267 {offsets = [0, 0], sizes = [8, 128], strides = [1, 1]} : vector<8x256xf32> to vector<8x128xf32>
    %272 = arith.addf %270, %271 : vector<8x128xf32>
    %273 = arith.index_cast %265 : i32 to index
    %c0_88 = arith.constant 0 : index
    %c128_89 = arith.constant 128 : index
    %274 = vector.load %arg10[%273, %c0_88, %c128_89] : memref<8x8x256xf32, #tpu.memory_space<vmem>>, vector<1x8x128xf32>
    %275 = vector.shape_cast %274 : vector<1x8x128xf32> to vector<8x128xf32>
    %276 = vector.extract_strided_slice %267 {offsets = [0, 128], sizes = [8, 128], strides = [1, 1]} : vector<8x256xf32> to vector<8x128xf32>
    %277 = arith.addf %275, %276 : vector<8x128xf32>
    %278 = vector.extract_strided_slice %272 {offsets = [0, 0], sizes = [8, 32], strides = [1, 1]} : vector<8x128xf32> to vector<8x32xf32>
    %cst_90 = arith.constant 5.000000e-01 : f32
    %279 = vector.broadcast %cst_90 : f32 to vector<8x32xf32>
    %280 = arith.mulf %279, %278 : vector<8x32xf32>
    %281 = math.tanh %280 : vector<8x32xf32>
    %cst_91 = arith.constant 1.000000e+00 : f32
    %282 = vector.broadcast %cst_91 : f32 to vector<8x32xf32>
    %283 = arith.addf %281, %282 : vector<8x32xf32>
    %cst_92 = arith.constant 5.000000e-01 : f32
    %284 = vector.broadcast %cst_92 : f32 to vector<8x32xf32>
    %285 = arith.mulf %284, %283 : vector<8x32xf32>
    %286 = vector.extract_strided_slice %272 {offsets = [0, 32], sizes = [8, 32], strides = [1, 1]} : vector<8x128xf32> to vector<8x32xf32>
    %cst_93 = arith.constant 5.000000e-01 : f32
    %287 = vector.broadcast %cst_93 : f32 to vector<8x32xf32>
    %288 = arith.mulf %287, %286 : vector<8x32xf32>
    %289 = math.tanh %288 : vector<8x32xf32>
    %cst_94 = arith.constant 1.000000e+00 : f32
    %290 = vector.broadcast %cst_94 : f32 to vector<8x32xf32>
    %291 = arith.addf %289, %290 : vector<8x32xf32>
    %cst_95 = arith.constant 5.000000e-01 : f32
    %292 = vector.broadcast %cst_95 : f32 to vector<8x32xf32>
    %293 = arith.mulf %292, %291 : vector<8x32xf32>
    %294 = vector.extract_strided_slice %272 {offsets = [0, 64], sizes = [8, 32], strides = [1, 1]} : vector<8x128xf32> to vector<8x32xf32>
    %295 = math.tanh %294 : vector<8x32xf32>
    %296 = vector.extract_strided_slice %272 {offsets = [0, 96], sizes = [8, 32], strides = [1, 1]} : vector<8x128xf32> to vector<8x32xf32>
    %cst_96 = arith.constant 5.000000e-01 : f32
    %297 = vector.broadcast %cst_96 : f32 to vector<8x32xf32>
    %298 = arith.mulf %297, %296 : vector<8x32xf32>
    %299 = math.tanh %298 : vector<8x32xf32>
    %cst_97 = arith.constant 1.000000e+00 : f32
    %300 = vector.broadcast %cst_97 : f32 to vector<8x32xf32>
    %301 = arith.addf %299, %300 : vector<8x32xf32>
    %cst_98 = arith.constant 5.000000e-01 : f32
    %302 = vector.broadcast %cst_98 : f32 to vector<8x32xf32>
    %303 = arith.mulf %302, %301 : vector<8x32xf32>
    %304 = arith.mulf %293, %262 : vector<8x32xf32>
    %305 = arith.mulf %285, %295 : vector<8x32xf32>
    %306 = arith.addf %304, %305 : vector<8x32xf32>
    %307 = math.tanh %306 : vector<8x32xf32>
    %308 = arith.mulf %303, %307 : vector<8x32xf32>
    %309 = vector.extract_strided_slice %277 {offsets = [0, 0], sizes = [8, 32], strides = [1, 1]} : vector<8x128xf32> to vector<8x32xf32>
    %cst_99 = arith.constant 5.000000e-01 : f32
    %310 = vector.broadcast %cst_99 : f32 to vector<8x32xf32>
    %311 = arith.mulf %310, %309 : vector<8x32xf32>
    %312 = math.tanh %311 : vector<8x32xf32>
    %cst_100 = arith.constant 1.000000e+00 : f32
    %313 = vector.broadcast %cst_100 : f32 to vector<8x32xf32>
    %314 = arith.addf %312, %313 : vector<8x32xf32>
    %cst_101 = arith.constant 5.000000e-01 : f32
    %315 = vector.broadcast %cst_101 : f32 to vector<8x32xf32>
    %316 = arith.mulf %315, %314 : vector<8x32xf32>
    %317 = vector.extract_strided_slice %277 {offsets = [0, 32], sizes = [8, 32], strides = [1, 1]} : vector<8x128xf32> to vector<8x32xf32>
    %cst_102 = arith.constant 5.000000e-01 : f32
    %318 = vector.broadcast %cst_102 : f32 to vector<8x32xf32>
    %319 = arith.mulf %318, %317 : vector<8x32xf32>
    %320 = math.tanh %319 : vector<8x32xf32>
    %cst_103 = arith.constant 1.000000e+00 : f32
    %321 = vector.broadcast %cst_103 : f32 to vector<8x32xf32>
    %322 = arith.addf %320, %321 : vector<8x32xf32>
    %cst_104 = arith.constant 5.000000e-01 : f32
    %323 = vector.broadcast %cst_104 : f32 to vector<8x32xf32>
    %324 = arith.mulf %323, %322 : vector<8x32xf32>
    %325 = vector.extract_strided_slice %277 {offsets = [0, 64], sizes = [8, 32], strides = [1, 1]} : vector<8x128xf32> to vector<8x32xf32>
    %326 = math.tanh %325 : vector<8x32xf32>
    %327 = vector.extract_strided_slice %277 {offsets = [0, 96], sizes = [8, 32], strides = [1, 1]} : vector<8x128xf32> to vector<8x32xf32>
    %cst_105 = arith.constant 5.000000e-01 : f32
    %328 = vector.broadcast %cst_105 : f32 to vector<8x32xf32>
    %329 = arith.mulf %328, %327 : vector<8x32xf32>
    %330 = math.tanh %329 : vector<8x32xf32>
    %cst_106 = arith.constant 1.000000e+00 : f32
    %331 = vector.broadcast %cst_106 : f32 to vector<8x32xf32>
    %332 = arith.addf %330, %331 : vector<8x32xf32>
    %cst_107 = arith.constant 5.000000e-01 : f32
    %333 = vector.broadcast %cst_107 : f32 to vector<8x32xf32>
    %334 = arith.mulf %333, %332 : vector<8x32xf32>
    %335 = arith.mulf %324, %264 : vector<8x32xf32>
    %336 = arith.mulf %316, %326 : vector<8x32xf32>
    %337 = arith.addf %335, %336 : vector<8x32xf32>
    %338 = math.tanh %337 : vector<8x32xf32>
    %339 = arith.mulf %334, %338 : vector<8x32xf32>
    %340 = vector.broadcast %c3_i32 : i32 to vector<8x32xi32>
    %341 = arith.cmpi slt, %340, %12 : vector<8x32xi32>
    %342 = vector.broadcast %c3_i32 : i32 to vector<8x32xi32>
    %343 = arith.cmpi sge, %342, %14 : vector<8x32xi32>
    %344 = arith.select %341, %308, %261 : vector<8x32xi1>, vector<8x32xf32>
    %345 = arith.select %341, %306, %262 : vector<8x32xi1>, vector<8x32xf32>
    %346 = arith.select %343, %339, %263 : vector<8x32xi1>, vector<8x32xf32>
    %347 = arith.select %343, %337, %264 : vector<8x32xi1>, vector<8x32xf32>
    %c4_i32 = arith.constant 4 : i32
    %c7_i32_108 = arith.constant 7 : i32
    %348 = arith.subi %c7_i32_108, %c4_i32 : i32
    %349 = tpu.concatenate %344, %346 in 1 : vector<8x32xf32>, vector<8x32xf32> -> vector<8x64xf32>
    %cst_109 = arith.constant dense<0.000000e+00> : vector<8x256xf32>
    %350 = tpu.matmul %349, %9, %cst_109 {dimension_numbers = #tpu.dot_dimension_numbers<[1], [0], [0], [1], [0, 0, 1, 1], [], []>} : vector<8x64xf32>, vector<64x256xf32>, vector<8x256xf32> -> vector<8x256xf32>
    %351 = arith.index_cast %c4_i32 : i32 to index
    %c0_110 = arith.constant 0 : index
    %c0_111 = arith.constant 0 : index
    %352 = vector.load %arg10[%351, %c0_110, %c0_111] : memref<8x8x256xf32, #tpu.memory_space<vmem>>, vector<1x8x128xf32>
    %353 = vector.shape_cast %352 : vector<1x8x128xf32> to vector<8x128xf32>
    %354 = vector.extract_strided_slice %350 {offsets = [0, 0], sizes = [8, 128], strides = [1, 1]} : vector<8x256xf32> to vector<8x128xf32>
    %355 = arith.addf %353, %354 : vector<8x128xf32>
    %356 = arith.index_cast %348 : i32 to index
    %c0_112 = arith.constant 0 : index
    %c128_113 = arith.constant 128 : index
    %357 = vector.load %arg10[%356, %c0_112, %c128_113] : memref<8x8x256xf32, #tpu.memory_space<vmem>>, vector<1x8x128xf32>
    %358 = vector.shape_cast %357 : vector<1x8x128xf32> to vector<8x128xf32>
    %359 = vector.extract_strided_slice %350 {offsets = [0, 128], sizes = [8, 128], strides = [1, 1]} : vector<8x256xf32> to vector<8x128xf32>
    %360 = arith.addf %358, %359 : vector<8x128xf32>
    %361 = vector.extract_strided_slice %355 {offsets = [0, 0], sizes = [8, 32], strides = [1, 1]} : vector<8x128xf32> to vector<8x32xf32>
    %cst_114 = arith.constant 5.000000e-01 : f32
    %362 = vector.broadcast %cst_114 : f32 to vector<8x32xf32>
    %363 = arith.mulf %362, %361 : vector<8x32xf32>
    %364 = math.tanh %363 : vector<8x32xf32>
    %cst_115 = arith.constant 1.000000e+00 : f32
    %365 = vector.broadcast %cst_115 : f32 to vector<8x32xf32>
    %366 = arith.addf %364, %365 : vector<8x32xf32>
    %cst_116 = arith.constant 5.000000e-01 : f32
    %367 = vector.broadcast %cst_116 : f32 to vector<8x32xf32>
    %368 = arith.mulf %367, %366 : vector<8x32xf32>
    %369 = vector.extract_strided_slice %355 {offsets = [0, 32], sizes = [8, 32], strides = [1, 1]} : vector<8x128xf32> to vector<8x32xf32>
    %cst_117 = arith.constant 5.000000e-01 : f32
    %370 = vector.broadcast %cst_117 : f32 to vector<8x32xf32>
    %371 = arith.mulf %370, %369 : vector<8x32xf32>
    %372 = math.tanh %371 : vector<8x32xf32>
    %cst_118 = arith.constant 1.000000e+00 : f32
    %373 = vector.broadcast %cst_118 : f32 to vector<8x32xf32>
    %374 = arith.addf %372, %373 : vector<8x32xf32>
    %cst_119 = arith.constant 5.000000e-01 : f32
    %375 = vector.broadcast %cst_119 : f32 to vector<8x32xf32>
    %376 = arith.mulf %375, %374 : vector<8x32xf32>
    %377 = vector.extract_strided_slice %355 {offsets = [0, 64], sizes = [8, 32], strides = [1, 1]} : vector<8x128xf32> to vector<8x32xf32>
    %378 = math.tanh %377 : vector<8x32xf32>
    %379 = vector.extract_strided_slice %355 {offsets = [0, 96], sizes = [8, 32], strides = [1, 1]} : vector<8x128xf32> to vector<8x32xf32>
    %cst_120 = arith.constant 5.000000e-01 : f32
    %380 = vector.broadcast %cst_120 : f32 to vector<8x32xf32>
    %381 = arith.mulf %380, %379 : vector<8x32xf32>
    %382 = math.tanh %381 : vector<8x32xf32>
    %cst_121 = arith.constant 1.000000e+00 : f32
    %383 = vector.broadcast %cst_121 : f32 to vector<8x32xf32>
    %384 = arith.addf %382, %383 : vector<8x32xf32>
    %cst_122 = arith.constant 5.000000e-01 : f32
    %385 = vector.broadcast %cst_122 : f32 to vector<8x32xf32>
    %386 = arith.mulf %385, %384 : vector<8x32xf32>
    %387 = arith.mulf %376, %345 : vector<8x32xf32>
    %388 = arith.mulf %368, %378 : vector<8x32xf32>
    %389 = arith.addf %387, %388 : vector<8x32xf32>
    %390 = math.tanh %389 : vector<8x32xf32>
    %391 = arith.mulf %386, %390 : vector<8x32xf32>
    %392 = vector.extract_strided_slice %360 {offsets = [0, 0], sizes = [8, 32], strides = [1, 1]} : vector<8x128xf32> to vector<8x32xf32>
    %cst_123 = arith.constant 5.000000e-01 : f32
    %393 = vector.broadcast %cst_123 : f32 to vector<8x32xf32>
    %394 = arith.mulf %393, %392 : vector<8x32xf32>
    %395 = math.tanh %394 : vector<8x32xf32>
    %cst_124 = arith.constant 1.000000e+00 : f32
    %396 = vector.broadcast %cst_124 : f32 to vector<8x32xf32>
    %397 = arith.addf %395, %396 : vector<8x32xf32>
    %cst_125 = arith.constant 5.000000e-01 : f32
    %398 = vector.broadcast %cst_125 : f32 to vector<8x32xf32>
    %399 = arith.mulf %398, %397 : vector<8x32xf32>
    %400 = vector.extract_strided_slice %360 {offsets = [0, 32], sizes = [8, 32], strides = [1, 1]} : vector<8x128xf32> to vector<8x32xf32>
    %cst_126 = arith.constant 5.000000e-01 : f32
    %401 = vector.broadcast %cst_126 : f32 to vector<8x32xf32>
    %402 = arith.mulf %401, %400 : vector<8x32xf32>
    %403 = math.tanh %402 : vector<8x32xf32>
    %cst_127 = arith.constant 1.000000e+00 : f32
    %404 = vector.broadcast %cst_127 : f32 to vector<8x32xf32>
    %405 = arith.addf %403, %404 : vector<8x32xf32>
    %cst_128 = arith.constant 5.000000e-01 : f32
    %406 = vector.broadcast %cst_128 : f32 to vector<8x32xf32>
    %407 = arith.mulf %406, %405 : vector<8x32xf32>
    %408 = vector.extract_strided_slice %360 {offsets = [0, 64], sizes = [8, 32], strides = [1, 1]} : vector<8x128xf32> to vector<8x32xf32>
    %409 = math.tanh %408 : vector<8x32xf32>
    %410 = vector.extract_strided_slice %360 {offsets = [0, 96], sizes = [8, 32], strides = [1, 1]} : vector<8x128xf32> to vector<8x32xf32>
    %cst_129 = arith.constant 5.000000e-01 : f32
    %411 = vector.broadcast %cst_129 : f32 to vector<8x32xf32>
    %412 = arith.mulf %411, %410 : vector<8x32xf32>
    %413 = math.tanh %412 : vector<8x32xf32>
    %cst_130 = arith.constant 1.000000e+00 : f32
    %414 = vector.broadcast %cst_130 : f32 to vector<8x32xf32>
    %415 = arith.addf %413, %414 : vector<8x32xf32>
    %cst_131 = arith.constant 5.000000e-01 : f32
    %416 = vector.broadcast %cst_131 : f32 to vector<8x32xf32>
    %417 = arith.mulf %416, %415 : vector<8x32xf32>
    %418 = arith.mulf %407, %347 : vector<8x32xf32>
    %419 = arith.mulf %399, %409 : vector<8x32xf32>
    %420 = arith.addf %418, %419 : vector<8x32xf32>
    %421 = math.tanh %420 : vector<8x32xf32>
    %422 = arith.mulf %417, %421 : vector<8x32xf32>
    %423 = vector.broadcast %c4_i32 : i32 to vector<8x32xi32>
    %424 = arith.cmpi slt, %423, %12 : vector<8x32xi32>
    %425 = vector.broadcast %c4_i32 : i32 to vector<8x32xi32>
    %426 = arith.cmpi sge, %425, %14 : vector<8x32xi32>
    %427 = arith.select %424, %391, %344 : vector<8x32xi1>, vector<8x32xf32>
    %428 = arith.select %424, %389, %345 : vector<8x32xi1>, vector<8x32xf32>
    %429 = arith.select %426, %422, %346 : vector<8x32xi1>, vector<8x32xf32>
    %430 = arith.select %426, %420, %347 : vector<8x32xi1>, vector<8x32xf32>
    %c5_i32 = arith.constant 5 : i32
    %c7_i32_132 = arith.constant 7 : i32
    %431 = arith.subi %c7_i32_132, %c5_i32 : i32
    %432 = tpu.concatenate %427, %429 in 1 : vector<8x32xf32>, vector<8x32xf32> -> vector<8x64xf32>
    %cst_133 = arith.constant dense<0.000000e+00> : vector<8x256xf32>
    %433 = tpu.matmul %432, %9, %cst_133 {dimension_numbers = #tpu.dot_dimension_numbers<[1], [0], [0], [1], [0, 0, 1, 1], [], []>} : vector<8x64xf32>, vector<64x256xf32>, vector<8x256xf32> -> vector<8x256xf32>
    %434 = arith.index_cast %c5_i32 : i32 to index
    %c0_134 = arith.constant 0 : index
    %c0_135 = arith.constant 0 : index
    %435 = vector.load %arg10[%434, %c0_134, %c0_135] : memref<8x8x256xf32, #tpu.memory_space<vmem>>, vector<1x8x128xf32>
    %436 = vector.shape_cast %435 : vector<1x8x128xf32> to vector<8x128xf32>
    %437 = vector.extract_strided_slice %433 {offsets = [0, 0], sizes = [8, 128], strides = [1, 1]} : vector<8x256xf32> to vector<8x128xf32>
    %438 = arith.addf %436, %437 : vector<8x128xf32>
    %439 = arith.index_cast %431 : i32 to index
    %c0_136 = arith.constant 0 : index
    %c128_137 = arith.constant 128 : index
    %440 = vector.load %arg10[%439, %c0_136, %c128_137] : memref<8x8x256xf32, #tpu.memory_space<vmem>>, vector<1x8x128xf32>
    %441 = vector.shape_cast %440 : vector<1x8x128xf32> to vector<8x128xf32>
    %442 = vector.extract_strided_slice %433 {offsets = [0, 128], sizes = [8, 128], strides = [1, 1]} : vector<8x256xf32> to vector<8x128xf32>
    %443 = arith.addf %441, %442 : vector<8x128xf32>
    %444 = vector.extract_strided_slice %438 {offsets = [0, 0], sizes = [8, 32], strides = [1, 1]} : vector<8x128xf32> to vector<8x32xf32>
    %cst_138 = arith.constant 5.000000e-01 : f32
    %445 = vector.broadcast %cst_138 : f32 to vector<8x32xf32>
    %446 = arith.mulf %445, %444 : vector<8x32xf32>
    %447 = math.tanh %446 : vector<8x32xf32>
    %cst_139 = arith.constant 1.000000e+00 : f32
    %448 = vector.broadcast %cst_139 : f32 to vector<8x32xf32>
    %449 = arith.addf %447, %448 : vector<8x32xf32>
    %cst_140 = arith.constant 5.000000e-01 : f32
    %450 = vector.broadcast %cst_140 : f32 to vector<8x32xf32>
    %451 = arith.mulf %450, %449 : vector<8x32xf32>
    %452 = vector.extract_strided_slice %438 {offsets = [0, 32], sizes = [8, 32], strides = [1, 1]} : vector<8x128xf32> to vector<8x32xf32>
    %cst_141 = arith.constant 5.000000e-01 : f32
    %453 = vector.broadcast %cst_141 : f32 to vector<8x32xf32>
    %454 = arith.mulf %453, %452 : vector<8x32xf32>
    %455 = math.tanh %454 : vector<8x32xf32>
    %cst_142 = arith.constant 1.000000e+00 : f32
    %456 = vector.broadcast %cst_142 : f32 to vector<8x32xf32>
    %457 = arith.addf %455, %456 : vector<8x32xf32>
    %cst_143 = arith.constant 5.000000e-01 : f32
    %458 = vector.broadcast %cst_143 : f32 to vector<8x32xf32>
    %459 = arith.mulf %458, %457 : vector<8x32xf32>
    %460 = vector.extract_strided_slice %438 {offsets = [0, 64], sizes = [8, 32], strides = [1, 1]} : vector<8x128xf32> to vector<8x32xf32>
    %461 = math.tanh %460 : vector<8x32xf32>
    %462 = vector.extract_strided_slice %438 {offsets = [0, 96], sizes = [8, 32], strides = [1, 1]} : vector<8x128xf32> to vector<8x32xf32>
    %cst_144 = arith.constant 5.000000e-01 : f32
    %463 = vector.broadcast %cst_144 : f32 to vector<8x32xf32>
    %464 = arith.mulf %463, %462 : vector<8x32xf32>
    %465 = math.tanh %464 : vector<8x32xf32>
    %cst_145 = arith.constant 1.000000e+00 : f32
    %466 = vector.broadcast %cst_145 : f32 to vector<8x32xf32>
    %467 = arith.addf %465, %466 : vector<8x32xf32>
    %cst_146 = arith.constant 5.000000e-01 : f32
    %468 = vector.broadcast %cst_146 : f32 to vector<8x32xf32>
    %469 = arith.mulf %468, %467 : vector<8x32xf32>
    %470 = arith.mulf %459, %428 : vector<8x32xf32>
    %471 = arith.mulf %451, %461 : vector<8x32xf32>
    %472 = arith.addf %470, %471 : vector<8x32xf32>
    %473 = math.tanh %472 : vector<8x32xf32>
    %474 = arith.mulf %469, %473 : vector<8x32xf32>
    %475 = vector.extract_strided_slice %443 {offsets = [0, 0], sizes = [8, 32], strides = [1, 1]} : vector<8x128xf32> to vector<8x32xf32>
    %cst_147 = arith.constant 5.000000e-01 : f32
    %476 = vector.broadcast %cst_147 : f32 to vector<8x32xf32>
    %477 = arith.mulf %476, %475 : vector<8x32xf32>
    %478 = math.tanh %477 : vector<8x32xf32>
    %cst_148 = arith.constant 1.000000e+00 : f32
    %479 = vector.broadcast %cst_148 : f32 to vector<8x32xf32>
    %480 = arith.addf %478, %479 : vector<8x32xf32>
    %cst_149 = arith.constant 5.000000e-01 : f32
    %481 = vector.broadcast %cst_149 : f32 to vector<8x32xf32>
    %482 = arith.mulf %481, %480 : vector<8x32xf32>
    %483 = vector.extract_strided_slice %443 {offsets = [0, 32], sizes = [8, 32], strides = [1, 1]} : vector<8x128xf32> to vector<8x32xf32>
    %cst_150 = arith.constant 5.000000e-01 : f32
    %484 = vector.broadcast %cst_150 : f32 to vector<8x32xf32>
    %485 = arith.mulf %484, %483 : vector<8x32xf32>
    %486 = math.tanh %485 : vector<8x32xf32>
    %cst_151 = arith.constant 1.000000e+00 : f32
    %487 = vector.broadcast %cst_151 : f32 to vector<8x32xf32>
    %488 = arith.addf %486, %487 : vector<8x32xf32>
    %cst_152 = arith.constant 5.000000e-01 : f32
    %489 = vector.broadcast %cst_152 : f32 to vector<8x32xf32>
    %490 = arith.mulf %489, %488 : vector<8x32xf32>
    %491 = vector.extract_strided_slice %443 {offsets = [0, 64], sizes = [8, 32], strides = [1, 1]} : vector<8x128xf32> to vector<8x32xf32>
    %492 = math.tanh %491 : vector<8x32xf32>
    %493 = vector.extract_strided_slice %443 {offsets = [0, 96], sizes = [8, 32], strides = [1, 1]} : vector<8x128xf32> to vector<8x32xf32>
    %cst_153 = arith.constant 5.000000e-01 : f32
    %494 = vector.broadcast %cst_153 : f32 to vector<8x32xf32>
    %495 = arith.mulf %494, %493 : vector<8x32xf32>
    %496 = math.tanh %495 : vector<8x32xf32>
    %cst_154 = arith.constant 1.000000e+00 : f32
    %497 = vector.broadcast %cst_154 : f32 to vector<8x32xf32>
    %498 = arith.addf %496, %497 : vector<8x32xf32>
    %cst_155 = arith.constant 5.000000e-01 : f32
    %499 = vector.broadcast %cst_155 : f32 to vector<8x32xf32>
    %500 = arith.mulf %499, %498 : vector<8x32xf32>
    %501 = arith.mulf %490, %430 : vector<8x32xf32>
    %502 = arith.mulf %482, %492 : vector<8x32xf32>
    %503 = arith.addf %501, %502 : vector<8x32xf32>
    %504 = math.tanh %503 : vector<8x32xf32>
    %505 = arith.mulf %500, %504 : vector<8x32xf32>
    %506 = vector.broadcast %c5_i32 : i32 to vector<8x32xi32>
    %507 = arith.cmpi slt, %506, %12 : vector<8x32xi32>
    %508 = vector.broadcast %c5_i32 : i32 to vector<8x32xi32>
    %509 = arith.cmpi sge, %508, %14 : vector<8x32xi32>
    %510 = arith.select %507, %474, %427 : vector<8x32xi1>, vector<8x32xf32>
    %511 = arith.select %507, %472, %428 : vector<8x32xi1>, vector<8x32xf32>
    %512 = arith.select %509, %505, %429 : vector<8x32xi1>, vector<8x32xf32>
    %513 = arith.select %509, %503, %430 : vector<8x32xi1>, vector<8x32xf32>
    %c6_i32 = arith.constant 6 : i32
    %c7_i32_156 = arith.constant 7 : i32
    %514 = arith.subi %c7_i32_156, %c6_i32 : i32
    %515 = tpu.concatenate %510, %512 in 1 : vector<8x32xf32>, vector<8x32xf32> -> vector<8x64xf32>
    %cst_157 = arith.constant dense<0.000000e+00> : vector<8x256xf32>
    %516 = tpu.matmul %515, %9, %cst_157 {dimension_numbers = #tpu.dot_dimension_numbers<[1], [0], [0], [1], [0, 0, 1, 1], [], []>} : vector<8x64xf32>, vector<64x256xf32>, vector<8x256xf32> -> vector<8x256xf32>
    %517 = arith.index_cast %c6_i32 : i32 to index
    %c0_158 = arith.constant 0 : index
    %c0_159 = arith.constant 0 : index
    %518 = vector.load %arg10[%517, %c0_158, %c0_159] : memref<8x8x256xf32, #tpu.memory_space<vmem>>, vector<1x8x128xf32>
    %519 = vector.shape_cast %518 : vector<1x8x128xf32> to vector<8x128xf32>
    %520 = vector.extract_strided_slice %516 {offsets = [0, 0], sizes = [8, 128], strides = [1, 1]} : vector<8x256xf32> to vector<8x128xf32>
    %521 = arith.addf %519, %520 : vector<8x128xf32>
    %522 = arith.index_cast %514 : i32 to index
    %c0_160 = arith.constant 0 : index
    %c128_161 = arith.constant 128 : index
    %523 = vector.load %arg10[%522, %c0_160, %c128_161] : memref<8x8x256xf32, #tpu.memory_space<vmem>>, vector<1x8x128xf32>
    %524 = vector.shape_cast %523 : vector<1x8x128xf32> to vector<8x128xf32>
    %525 = vector.extract_strided_slice %516 {offsets = [0, 128], sizes = [8, 128], strides = [1, 1]} : vector<8x256xf32> to vector<8x128xf32>
    %526 = arith.addf %524, %525 : vector<8x128xf32>
    %527 = vector.extract_strided_slice %521 {offsets = [0, 0], sizes = [8, 32], strides = [1, 1]} : vector<8x128xf32> to vector<8x32xf32>
    %cst_162 = arith.constant 5.000000e-01 : f32
    %528 = vector.broadcast %cst_162 : f32 to vector<8x32xf32>
    %529 = arith.mulf %528, %527 : vector<8x32xf32>
    %530 = math.tanh %529 : vector<8x32xf32>
    %cst_163 = arith.constant 1.000000e+00 : f32
    %531 = vector.broadcast %cst_163 : f32 to vector<8x32xf32>
    %532 = arith.addf %530, %531 : vector<8x32xf32>
    %cst_164 = arith.constant 5.000000e-01 : f32
    %533 = vector.broadcast %cst_164 : f32 to vector<8x32xf32>
    %534 = arith.mulf %533, %532 : vector<8x32xf32>
    %535 = vector.extract_strided_slice %521 {offsets = [0, 32], sizes = [8, 32], strides = [1, 1]} : vector<8x128xf32> to vector<8x32xf32>
    %cst_165 = arith.constant 5.000000e-01 : f32
    %536 = vector.broadcast %cst_165 : f32 to vector<8x32xf32>
    %537 = arith.mulf %536, %535 : vector<8x32xf32>
    %538 = math.tanh %537 : vector<8x32xf32>
    %cst_166 = arith.constant 1.000000e+00 : f32
    %539 = vector.broadcast %cst_166 : f32 to vector<8x32xf32>
    %540 = arith.addf %538, %539 : vector<8x32xf32>
    %cst_167 = arith.constant 5.000000e-01 : f32
    %541 = vector.broadcast %cst_167 : f32 to vector<8x32xf32>
    %542 = arith.mulf %541, %540 : vector<8x32xf32>
    %543 = vector.extract_strided_slice %521 {offsets = [0, 64], sizes = [8, 32], strides = [1, 1]} : vector<8x128xf32> to vector<8x32xf32>
    %544 = math.tanh %543 : vector<8x32xf32>
    %545 = vector.extract_strided_slice %521 {offsets = [0, 96], sizes = [8, 32], strides = [1, 1]} : vector<8x128xf32> to vector<8x32xf32>
    %cst_168 = arith.constant 5.000000e-01 : f32
    %546 = vector.broadcast %cst_168 : f32 to vector<8x32xf32>
    %547 = arith.mulf %546, %545 : vector<8x32xf32>
    %548 = math.tanh %547 : vector<8x32xf32>
    %cst_169 = arith.constant 1.000000e+00 : f32
    %549 = vector.broadcast %cst_169 : f32 to vector<8x32xf32>
    %550 = arith.addf %548, %549 : vector<8x32xf32>
    %cst_170 = arith.constant 5.000000e-01 : f32
    %551 = vector.broadcast %cst_170 : f32 to vector<8x32xf32>
    %552 = arith.mulf %551, %550 : vector<8x32xf32>
    %553 = arith.mulf %542, %511 : vector<8x32xf32>
    %554 = arith.mulf %534, %544 : vector<8x32xf32>
    %555 = arith.addf %553, %554 : vector<8x32xf32>
    %556 = math.tanh %555 : vector<8x32xf32>
    %557 = arith.mulf %552, %556 : vector<8x32xf32>
    %558 = vector.extract_strided_slice %526 {offsets = [0, 0], sizes = [8, 32], strides = [1, 1]} : vector<8x128xf32> to vector<8x32xf32>
    %cst_171 = arith.constant 5.000000e-01 : f32
    %559 = vector.broadcast %cst_171 : f32 to vector<8x32xf32>
    %560 = arith.mulf %559, %558 : vector<8x32xf32>
    %561 = math.tanh %560 : vector<8x32xf32>
    %cst_172 = arith.constant 1.000000e+00 : f32
    %562 = vector.broadcast %cst_172 : f32 to vector<8x32xf32>
    %563 = arith.addf %561, %562 : vector<8x32xf32>
    %cst_173 = arith.constant 5.000000e-01 : f32
    %564 = vector.broadcast %cst_173 : f32 to vector<8x32xf32>
    %565 = arith.mulf %564, %563 : vector<8x32xf32>
    %566 = vector.extract_strided_slice %526 {offsets = [0, 32], sizes = [8, 32], strides = [1, 1]} : vector<8x128xf32> to vector<8x32xf32>
    %cst_174 = arith.constant 5.000000e-01 : f32
    %567 = vector.broadcast %cst_174 : f32 to vector<8x32xf32>
    %568 = arith.mulf %567, %566 : vector<8x32xf32>
    %569 = math.tanh %568 : vector<8x32xf32>
    %cst_175 = arith.constant 1.000000e+00 : f32
    %570 = vector.broadcast %cst_175 : f32 to vector<8x32xf32>
    %571 = arith.addf %569, %570 : vector<8x32xf32>
    %cst_176 = arith.constant 5.000000e-01 : f32
    %572 = vector.broadcast %cst_176 : f32 to vector<8x32xf32>
    %573 = arith.mulf %572, %571 : vector<8x32xf32>
    %574 = vector.extract_strided_slice %526 {offsets = [0, 64], sizes = [8, 32], strides = [1, 1]} : vector<8x128xf32> to vector<8x32xf32>
    %575 = math.tanh %574 : vector<8x32xf32>
    %576 = vector.extract_strided_slice %526 {offsets = [0, 96], sizes = [8, 32], strides = [1, 1]} : vector<8x128xf32> to vector<8x32xf32>
    %cst_177 = arith.constant 5.000000e-01 : f32
    %577 = vector.broadcast %cst_177 : f32 to vector<8x32xf32>
    %578 = arith.mulf %577, %576 : vector<8x32xf32>
    %579 = math.tanh %578 : vector<8x32xf32>
    %cst_178 = arith.constant 1.000000e+00 : f32
    %580 = vector.broadcast %cst_178 : f32 to vector<8x32xf32>
    %581 = arith.addf %579, %580 : vector<8x32xf32>
    %cst_179 = arith.constant 5.000000e-01 : f32
    %582 = vector.broadcast %cst_179 : f32 to vector<8x32xf32>
    %583 = arith.mulf %582, %581 : vector<8x32xf32>
    %584 = arith.mulf %573, %513 : vector<8x32xf32>
    %585 = arith.mulf %565, %575 : vector<8x32xf32>
    %586 = arith.addf %584, %585 : vector<8x32xf32>
    %587 = math.tanh %586 : vector<8x32xf32>
    %588 = arith.mulf %583, %587 : vector<8x32xf32>
    %589 = vector.broadcast %c6_i32 : i32 to vector<8x32xi32>
    %590 = arith.cmpi slt, %589, %12 : vector<8x32xi32>
    %591 = vector.broadcast %c6_i32 : i32 to vector<8x32xi32>
    %592 = arith.cmpi sge, %591, %14 : vector<8x32xi32>
    %593 = arith.select %590, %557, %510 : vector<8x32xi1>, vector<8x32xf32>
    %594 = arith.select %590, %555, %511 : vector<8x32xi1>, vector<8x32xf32>
    %595 = arith.select %592, %588, %512 : vector<8x32xi1>, vector<8x32xf32>
    %596 = arith.select %592, %586, %513 : vector<8x32xi1>, vector<8x32xf32>
    %c7_i32_180 = arith.constant 7 : i32
    %c7_i32_181 = arith.constant 7 : i32
    %597 = arith.subi %c7_i32_181, %c7_i32_180 : i32
    %598 = tpu.concatenate %593, %595 in 1 : vector<8x32xf32>, vector<8x32xf32> -> vector<8x64xf32>
    %cst_182 = arith.constant dense<0.000000e+00> : vector<8x256xf32>
    %599 = tpu.matmul %598, %9, %cst_182 {dimension_numbers = #tpu.dot_dimension_numbers<[1], [0], [0], [1], [0, 0, 1, 1], [], []>} : vector<8x64xf32>, vector<64x256xf32>, vector<8x256xf32> -> vector<8x256xf32>
    %600 = arith.index_cast %c7_i32_180 : i32 to index
    %c0_183 = arith.constant 0 : index
    %c0_184 = arith.constant 0 : index
    %601 = vector.load %arg10[%600, %c0_183, %c0_184] : memref<8x8x256xf32, #tpu.memory_space<vmem>>, vector<1x8x128xf32>
    %602 = vector.shape_cast %601 : vector<1x8x128xf32> to vector<8x128xf32>
    %603 = vector.extract_strided_slice %599 {offsets = [0, 0], sizes = [8, 128], strides = [1, 1]} : vector<8x256xf32> to vector<8x128xf32>
    %604 = arith.addf %602, %603 : vector<8x128xf32>
    %605 = arith.index_cast %597 : i32 to index
    %c0_185 = arith.constant 0 : index
    %c128_186 = arith.constant 128 : index
    %606 = vector.load %arg10[%605, %c0_185, %c128_186] : memref<8x8x256xf32, #tpu.memory_space<vmem>>, vector<1x8x128xf32>
    %607 = vector.shape_cast %606 : vector<1x8x128xf32> to vector<8x128xf32>
    %608 = vector.extract_strided_slice %599 {offsets = [0, 128], sizes = [8, 128], strides = [1, 1]} : vector<8x256xf32> to vector<8x128xf32>
    %609 = arith.addf %607, %608 : vector<8x128xf32>
    %610 = vector.extract_strided_slice %604 {offsets = [0, 0], sizes = [8, 32], strides = [1, 1]} : vector<8x128xf32> to vector<8x32xf32>
    %cst_187 = arith.constant 5.000000e-01 : f32
    %611 = vector.broadcast %cst_187 : f32 to vector<8x32xf32>
    %612 = arith.mulf %611, %610 : vector<8x32xf32>
    %613 = math.tanh %612 : vector<8x32xf32>
    %cst_188 = arith.constant 1.000000e+00 : f32
    %614 = vector.broadcast %cst_188 : f32 to vector<8x32xf32>
    %615 = arith.addf %613, %614 : vector<8x32xf32>
    %cst_189 = arith.constant 5.000000e-01 : f32
    %616 = vector.broadcast %cst_189 : f32 to vector<8x32xf32>
    %617 = arith.mulf %616, %615 : vector<8x32xf32>
    %618 = vector.extract_strided_slice %604 {offsets = [0, 32], sizes = [8, 32], strides = [1, 1]} : vector<8x128xf32> to vector<8x32xf32>
    %cst_190 = arith.constant 5.000000e-01 : f32
    %619 = vector.broadcast %cst_190 : f32 to vector<8x32xf32>
    %620 = arith.mulf %619, %618 : vector<8x32xf32>
    %621 = math.tanh %620 : vector<8x32xf32>
    %cst_191 = arith.constant 1.000000e+00 : f32
    %622 = vector.broadcast %cst_191 : f32 to vector<8x32xf32>
    %623 = arith.addf %621, %622 : vector<8x32xf32>
    %cst_192 = arith.constant 5.000000e-01 : f32
    %624 = vector.broadcast %cst_192 : f32 to vector<8x32xf32>
    %625 = arith.mulf %624, %623 : vector<8x32xf32>
    %626 = vector.extract_strided_slice %604 {offsets = [0, 64], sizes = [8, 32], strides = [1, 1]} : vector<8x128xf32> to vector<8x32xf32>
    %627 = math.tanh %626 : vector<8x32xf32>
    %628 = vector.extract_strided_slice %604 {offsets = [0, 96], sizes = [8, 32], strides = [1, 1]} : vector<8x128xf32> to vector<8x32xf32>
    %cst_193 = arith.constant 5.000000e-01 : f32
    %629 = vector.broadcast %cst_193 : f32 to vector<8x32xf32>
    %630 = arith.mulf %629, %628 : vector<8x32xf32>
    %631 = math.tanh %630 : vector<8x32xf32>
    %cst_194 = arith.constant 1.000000e+00 : f32
    %632 = vector.broadcast %cst_194 : f32 to vector<8x32xf32>
    %633 = arith.addf %631, %632 : vector<8x32xf32>
    %cst_195 = arith.constant 5.000000e-01 : f32
    %634 = vector.broadcast %cst_195 : f32 to vector<8x32xf32>
    %635 = arith.mulf %634, %633 : vector<8x32xf32>
    %636 = arith.mulf %625, %594 : vector<8x32xf32>
    %637 = arith.mulf %617, %627 : vector<8x32xf32>
    %638 = arith.addf %636, %637 : vector<8x32xf32>
    %639 = math.tanh %638 : vector<8x32xf32>
    %640 = arith.mulf %635, %639 : vector<8x32xf32>
    %641 = vector.extract_strided_slice %609 {offsets = [0, 0], sizes = [8, 32], strides = [1, 1]} : vector<8x128xf32> to vector<8x32xf32>
    %cst_196 = arith.constant 5.000000e-01 : f32
    %642 = vector.broadcast %cst_196 : f32 to vector<8x32xf32>
    %643 = arith.mulf %642, %641 : vector<8x32xf32>
    %644 = math.tanh %643 : vector<8x32xf32>
    %cst_197 = arith.constant 1.000000e+00 : f32
    %645 = vector.broadcast %cst_197 : f32 to vector<8x32xf32>
    %646 = arith.addf %644, %645 : vector<8x32xf32>
    %cst_198 = arith.constant 5.000000e-01 : f32
    %647 = vector.broadcast %cst_198 : f32 to vector<8x32xf32>
    %648 = arith.mulf %647, %646 : vector<8x32xf32>
    %649 = vector.extract_strided_slice %609 {offsets = [0, 32], sizes = [8, 32], strides = [1, 1]} : vector<8x128xf32> to vector<8x32xf32>
    %cst_199 = arith.constant 5.000000e-01 : f32
    %650 = vector.broadcast %cst_199 : f32 to vector<8x32xf32>
    %651 = arith.mulf %650, %649 : vector<8x32xf32>
    %652 = math.tanh %651 : vector<8x32xf32>
    %cst_200 = arith.constant 1.000000e+00 : f32
    %653 = vector.broadcast %cst_200 : f32 to vector<8x32xf32>
    %654 = arith.addf %652, %653 : vector<8x32xf32>
    %cst_201 = arith.constant 5.000000e-01 : f32
    %655 = vector.broadcast %cst_201 : f32 to vector<8x32xf32>
    %656 = arith.mulf %655, %654 : vector<8x32xf32>
    %657 = vector.extract_strided_slice %609 {offsets = [0, 64], sizes = [8, 32], strides = [1, 1]} : vector<8x128xf32> to vector<8x32xf32>
    %658 = math.tanh %657 : vector<8x32xf32>
    %659 = vector.extract_strided_slice %609 {offsets = [0, 96], sizes = [8, 32], strides = [1, 1]} : vector<8x128xf32> to vector<8x32xf32>
    %cst_202 = arith.constant 5.000000e-01 : f32
    %660 = vector.broadcast %cst_202 : f32 to vector<8x32xf32>
    %661 = arith.mulf %660, %659 : vector<8x32xf32>
    %662 = math.tanh %661 : vector<8x32xf32>
    %cst_203 = arith.constant 1.000000e+00 : f32
    %663 = vector.broadcast %cst_203 : f32 to vector<8x32xf32>
    %664 = arith.addf %662, %663 : vector<8x32xf32>
    %cst_204 = arith.constant 5.000000e-01 : f32
    %665 = vector.broadcast %cst_204 : f32 to vector<8x32xf32>
    %666 = arith.mulf %665, %664 : vector<8x32xf32>
    %667 = arith.mulf %656, %596 : vector<8x32xf32>
    %668 = arith.mulf %648, %658 : vector<8x32xf32>
    %669 = arith.addf %667, %668 : vector<8x32xf32>
    %670 = math.tanh %669 : vector<8x32xf32>
    %671 = arith.mulf %666, %670 : vector<8x32xf32>
    %672 = vector.broadcast %c7_i32_180 : i32 to vector<8x32xi32>
    %673 = arith.cmpi slt, %672, %12 : vector<8x32xi32>
    %674 = vector.broadcast %c7_i32_180 : i32 to vector<8x32xi32>
    %675 = arith.cmpi sge, %674, %14 : vector<8x32xi32>
    %676 = arith.select %673, %640, %593 : vector<8x32xi1>, vector<8x32xf32>
    %677 = arith.select %673, %638, %594 : vector<8x32xi1>, vector<8x32xf32>
    %678 = arith.select %675, %671, %595 : vector<8x32xi1>, vector<8x32xf32>
    %679 = arith.select %675, %669, %596 : vector<8x32xi1>, vector<8x32xf32>
    %c8_i32_205 = arith.constant 8 : i32
    %c0_206 = arith.constant 0 : index
    %c0_207 = arith.constant 0 : index
    %680 = vector.load %arg6[%c0_206, %c0_207] : memref<32x64xf32, #tpu.memory_space<vmem>>, vector<32x64xf32>
    %cst_208 = arith.constant dense<0.000000e+00> : vector<8x64xf32>
    %681 = tpu.matmul %676, %680, %cst_208 {dimension_numbers = #tpu.dot_dimension_numbers<[1], [0], [0], [1], [0, 0, 1, 1], [], []>} : vector<8x32xf32>, vector<32x64xf32>, vector<8x64xf32> -> vector<8x64xf32>
    %c0_209 = arith.constant 0 : index
    %c0_210 = arith.constant 0 : index
    %682 = vector.load %arg7[%c0_209, %c0_210] : memref<32x64xf32, #tpu.memory_space<vmem>>, vector<32x64xf32>
    %cst_211 = arith.constant dense<0.000000e+00> : vector<8x64xf32>
    %683 = tpu.matmul %678, %682, %cst_211 {dimension_numbers = #tpu.dot_dimension_numbers<[1], [0], [0], [1], [0, 0, 1, 1], [], []>} : vector<8x32xf32>, vector<32x64xf32>, vector<8x64xf32> -> vector<8x64xf32>
    %684 = arith.addf %681, %683 : vector<8x64xf32>
    %c0_212 = arith.constant 0 : index
    %c0_213 = arith.constant 0 : index
    %685 = vector.load %arg8[%c0_212, %c0_213] : memref<1x64xf32, #tpu.memory_space<vmem>>, vector<1x64xf32>
    %686 = vector.broadcast %685 : vector<1x64xf32> to vector<8x64xf32>
    %687 = arith.addf %684, %686 : vector<8x64xf32>
    %688 = math.tanh %687 : vector<8x64xf32>
    %c0_214 = arith.constant 0 : index
    %c0_215 = arith.constant 0 : index
    %689 = vector.load %arg9[%c0_214, %c0_215] : memref<8x64xf32, #tpu.memory_space<vmem>>, vector<8x64xf32>
    tpu.vector_store %arg9[%c0_214, %c0_215], %688 {strides = array<i32>} : memref<8x64xf32, #tpu.memory_space<vmem>>, vector<8x64xf32>,
    return
  }
  func.func @transform_0(%arg0: i32) -> (i32, i32, i32) {
    %c0_i32 = arith.constant 0 : i32
    %c0_i32_0 = arith.constant 0 : i32
    %c0_i32_1 = arith.constant 0 : i32
    return %c0_i32, %arg0, %c0_i32_0 : i32, i32, i32
  }
  func.func @transform_1(%arg0: i32) -> (i32, i32) {
    %c0_i32 = arith.constant 0 : i32
    %c0_i32_0 = arith.constant 0 : i32
    return %arg0, %c0_i32 : i32, i32
  }
  func.func @transform_2(%arg0: i32) -> (i32, i32) {
    %c0_i32 = arith.constant 0 : i32
    %c0_i32_0 = arith.constant 0 : i32
    %c0_i32_1 = arith.constant 0 : i32
    return %c0_i32, %c0_i32_0 : i32, i32
  }
  func.func @transform_3(%arg0: i32) -> (i32, i32) {
    %c0_i32 = arith.constant 0 : i32
    %c0_i32_0 = arith.constant 0 : i32
    %c0_i32_1 = arith.constant 0 : i32
    return %c0_i32, %c0_i32_0 : i32, i32
  }
  func.func @transform_4(%arg0: i32) -> (i32, i32) {
    %c0_i32 = arith.constant 0 : i32
    %c0_i32_0 = arith.constant 0 : i32
    %c0_i32_1 = arith.constant 0 : i32
    return %c0_i32, %c0_i32_0 : i32, i32
  }
  func.func @transform_5(%arg0: i32) -> (i32, i32) {
    %c0_i32 = arith.constant 0 : i32
    %c0_i32_0 = arith.constant 0 : i32
    %c0_i32_1 = arith.constant 0 : i32
    return %c0_i32, %c0_i32_0 : i32, i32
  }
  func.func @transform_6(%arg0: i32) -> (i32, i32) {
    %c0_i32 = arith.constant 0 : i32
    %c0_i32_0 = arith.constant 0 : i32
    %c0_i32_1 = arith.constant 0 : i32
    return %c0_i32, %c0_i32_0 : i32, i32
  }
  func.func @transform_7(%arg0: i32) -> (i32, i32) {
    %c0_i32 = arith.constant 0 : i32
    %c0_i32_0 = arith.constant 0 : i32
    %c0_i32_1 = arith.constant 0 : i32
    return %c0_i32, %c0_i32_0 : i32, i32
  }
  func.func @transform_8(%arg0: i32) -> (i32, i32) {
    %c0_i32 = arith.constant 0 : i32
    %c0_i32_0 = arith.constant 0 : i32
    return %arg0, %c0_i32 : i32, i32
  }
}

</mosaic_0001>

<bundles_post_ra>
// kernel: tpu_custom_call.1
= control target key start
LH: loop header
LB: loop body
LE: loop exit
PB: predicated region body
PF: predicated region fallthrough
CT: control target
= control target key end

     0   :  { %13 = vsyncpa [#allocation4], 0  ;;  %s2092_s0 = inlined_call_operand.hbm [shape: bf16[8,8,32], index: 0, kind: input, shape index: {}]   ;;  %s2093_s1 = inlined_call_operand.vmem [shape: s32[8,1], index: 1, kind: input, shape index: {}]   ;;  %s2094_s2 = inlined_call_operand.hbm [shape: bf16[32,256], index: 2, kind: input, shape index: {}]   ;;  %s2095_s3 = inlined_call_operand.hbm [shape: f32[64,256], index: 3, kind: input, shape index: {}]   ;;  %s2096_s4 = inlined_call_operand.vmem [shape: f32[1,256], index: 4, kind: input, shape index: {}]   ;;  %s2097_s5 = inlined_call_operand.hbm [shape: f32[32,64], index: 5, kind: input, shape index: {}]   ;;  %s2098_s6 = inlined_call_operand.hbm [shape: f32[32,64], index: 6, kind: input, shape index: {}]   ;;  %s2099_s7 = inlined_call_operand.vmem [shape: f32[1,64], index: 7, kind: input, shape index: {}]   ;;  %s2100_s8 = inlined_call_operand.hbm [shape: f32[8,64], index: 8, kind: output, shape index: {}]  }
   0x1   :  { %14 = vsyncpa [#allocation7], 0 }
   0x2   :  { %15 = vsyncpa [#allocation10], 0  ;;  %s36_s29 = sshll.u32 %s2094_s2, 4  ;;  %s37_s29 = int_to_ptr.hbm [resolvable:$true] %s36_s29 }
   0x3   :  { %16 = vsyncpa [#allocation5], 0  ;;  %s1536_s30 = smov [#allocation6]   ;;  %s64_s12 = sshll.u32 %s2097_s5, 4  ;;  %s65_s12 = int_to_ptr.hbm [resolvable:$true] %s64_s12 }
   0x4   :  { %s38_s9 = sshll.u32 %s1536_s30, 4  ;;  %s1537_s13 = smov 128   ;;  %s39_s9 = int_to_ptr.vmem [resolvable:$true] %s38_s9 }
   0x5   :  { %s1538_s14 = smov 8   ;;  %s1539_s15 = smov [#allocation9]  }
   0x6   :  { %44 = dma.hbm_to_vmem [thread:$0]  %s37_s29, 512, %s39_s9, [#allocation7], %s1537_s13, %s1537_s13, %s1538_s14  }
   0x7   :  { %s66_s16 = sshll.u32 %s1539_s15, 4  ;;  %s21_s18 = sshll.u32 %s2092_s0, 4  ;;  %s67_s16 = int_to_ptr.vmem [resolvable:$true] %s66_s16  ;;  %s22_s18 = int_to_ptr.hbm [resolvable:$true] %s21_s18 }
   0x8   :  { %72 = dma.hbm_to_vmem [thread:$0]  %s65_s12, 512, %s67_s16, [#allocation10], %s1537_s13, %s1537_s13, %s1538_s14  }
   0x9   :  { %s1540_s5 = smov [#allocation3]   ;;  %s49_s22 = sshll.u32 %s2095_s3, 4  ;;  %s50_s22 = int_to_ptr.hbm [resolvable:$true] %s49_s22 }
   0xa   :  { %s23_s19 = sshll.u32 %s1540_s5, 4  ;;  %s1541_s23 = smov 64   ;;  %s24_s19 = int_to_ptr.vmem [resolvable:$true] %s23_s19 }
   0xb   :  { %s1542_s24 = smov 4   ;;  %s1543_s0 = smov [#allocation8]  }
   0xc   :  { %29 = dma.hbm_to_vmem [thread:$0]  %s22_s18, 512, %s24_s19, [#allocation4], %s1541_s23, %s1541_s23, %s1542_s24  }
   0xd   :  { %s51_s25 = sshll.u32 %s1543_s0, 4  ;;  %s1544_s26 = smov 256   ;;  %s52_s25 = int_to_ptr.vmem [resolvable:$true] %s51_s25 }
   0xe   :  { %s1545_s27 = smov 16   ;;  %s77_s30 = sshll.u32 %s2098_s6, 4  ;;  %s78_s30 = int_to_ptr.hbm [resolvable:$true] %s77_s30 }
   0xf   :  { %57 = dma.hbm_to_vmem [thread:$0]  %s50_s22, 2048, %s52_s25, [#allocation7], %s1544_s26, %s1544_s26, %s1545_s27  }
  0x10   :  { %s1546_s9 = smov [#allocation11]  }
  0x11   :  { %s79_s10 = sshll.u32 %s1546_s9, 4  ;;  %s80_s10 = int_to_ptr.vmem [resolvable:$true] %s79_s10 }
  0x12   :  { %85 = dma.hbm_to_vmem [thread:$0]  %s78_s30, 512, %s80_s10, [#allocation10], %s1537_s13, %s1537_s13, %s1538_s14  }
  0x13   :  { %1528 = dma.done.wait [#allocation4], 512  }
  0x14   :  { %1529 = vsyncadd [#allocation4], 4294966784 }
  0x15   :  { %1530 = dma.done.wait [#allocation7], 2560  }
  0x16   :  { %1531 = vsyncadd [#allocation7], 4294964736 }
  0x17   :  { %1532 = dma.done.wait [#allocation10], 1024  }
  0x18   :  { %1533 = vsyncadd [#allocation10], 4294966272  ;;  %v1622_v0 = vld [vmem:[#allocation8 + $0x70] sm:$0xff]  ;;  %v1232_v2 = vld [vmem:[#allocation6 + $0x18] sm:$0xf0]  ;;  %vm167_vm0 = vcmask 261120  }
  0x19   :  { %v1266_v1 = vld [vmem:[#allocation6 + $0x14] sm:$0xf]  ;;  %287 = vmatpush.msra.mxu2 %v1622_v0  ;;  %v1625_v4 = vld [vmem:[#allocation8 + $0x60] sm:$0xff]  ;;  %v1224_v7 = vld [vmem:[#allocation6 + $0x8] sm:$0xf0]  ;;  %v1547_v25 = vmov 0.0  }
  0x1a   :  { %v1235_v3 = vor.u32 %v1266_v1, %v1232_v2  ;;  %v1264_v5 = vld [vmem:[#allocation6 + $0x4] sm:$0xf]  ;;  %v1627_v6 = vld [vmem:[#allocation8 + $0x50] sm:$0xff]  ;;  %v1267_v11 = vld [vmem:[#allocation6 + $0x14] sm:$0xf0]  ;;  %v1548_v61 = vmov 0  }
  0x1b   :  { %288 = vmatpush.msra.mxu2 %v1625_v4  ;;  %v1227_v8 = vor.u32 %v1264_v5, %v1224_v7  ;;  %v1230_v9 = vld [vmem:[#allocation6 + $0x10] sm:$0xf]  ;;  %v1630_v10 = vld [vmem:[#allocation8 + $0x40] sm:$0xff]  ;;  %v1265_v14 = vld [vmem:[#allocation6 + $0x4] sm:$0xf0]  ;;  %1283 = vset.pattern.permute.xlu2 %v1548_v61  ;;  %s1549_s12 = smov 32  }
  0x1c   :  { %215 = vmatpush.bf16.msra.mxu1 %v1235_v3  ;;  %v1231_v12 = vor.u32 %v1267_v11, %v1230_v9  ;;  %v1222_v13 = vld [vmem:[#allocation6] sm:$0xf]  ;;  %v1633_v15 = vld [vmem:[#allocation8 + $0x30] sm:$0xff]  ;;  %v1642_v20 = vld [vmem:[#allocation8 + $0x78] sm:$0xff]  ;;  %1284 = vset.pattern.permute.xlu0 %v1548_v61  ;;  %vm275_vm3 = vcmask 523264   ;;  %s1550_s14 = smov [#allocation12]  }
  0x1d   :  { %289 = vmatpush.msra.mxu2 %v1627_v6  ;;  %v1260_v16 = vld [vmem:[#allocation3] sm:$0xff]  ;;  %v1223_v18 = vor.u32 %v1265_v14, %v1222_v13  ;;  %v1640_v19 = vld [vmem:[#allocation8 + $0x10] sm:$0xff]  ;;  %v1644_v21 = vld [vmem:[#allocation8 + $0x68] sm:$0xff]  ;;  %307 = vmatpush.msra.mxu3 %v1642_v20  ;;  %s1190_s15 = sshll.u32 %s1550_s14, 4  ;;  %s1192_s2 = sshll.u32 %s2100_s8, 4  ;;  %s1191_s15 = int_to_ptr.vmem [resolvable:$true] %s1190_s15  ;;  %s1193_s2 = int_to_ptr.hbm [resolvable:$true] %s1192_s2 }
  0x1e   :  { %v1636_v17 = vld [vmem:[#allocation8 + $0x20] sm:$0xff]  ;;  %186 = vmatpush.bf16.msra.mxu0 %v1231_v12  ;;  %v1653_v23 = vld [vmem:[#allocation8 + $0x58] sm:$0xff]  ;;  %v1659_v24 = vld [vmem:[#allocation8 + $0x48] sm:$0xff] }
  0x1f   :  { %290 = vmatpush.msra.mxu2 %v1630_v10  ;;  %v1648_v22 = vld [vmem:[#allocation8] sm:$0xff]  ;;  %308 = vmatpush.msra.mxu3 %v1644_v21  ;;  %v1662_v26 = vld [vmem:[#allocation8 + $0x38] sm:$0xff]  ;;  %v1668_v27 = vld [vmem:[#allocation8 + $0x28] sm:$0xff] }
  0x20   :  { %216 = vmatpush.bf16.msra.mxu1 %v1227_v8  ;;  %v1261_v28 = vld [vmem:[#allocation3 + $0x8] sm:$0xff]  ;;  %v1684_v29 = vld [vmem:[#allocation8 + $0x18] sm:$0xff]  ;;  %v1262_v31 = vld [vmem:[#allocation3 + $0x10] sm:$0xff] }
  0x21   :  { %291 = vmatpush.msra.mxu2 %v1633_v15  ;;  %309 = vmatpush.msra.mxu3 %v1653_v23  ;;  %v1686_v30 = vld [vmem:[#allocation8 + $0x8] sm:$0xff]  ;;  %v1263_v32 = vld [vmem:[#allocation3 + $0x18] sm:$0xff]  ;;  %v121_v33 = vld [vmem:[%s2096_s4] sm:$0x3] }
  0x22   :  { %187 = vmatpush.bf16.msra.mxu0 %v1223_v18  ;;  %v124_v34 = vperm.slane %v121_v33, 1  ;;  %v1747_v37 = vperm.slane %v121_v33, 0  ;;  %v270_v60 = vld [vmem:[%s2093_s1] sm:$0xff] }
  0x23   :  { %1240 = vmatmul.msk.bf16.vlgmr.msra.gmra.mxu1 %vm167_vm0, %v1260_v16  ;;  %292 = vmatpush.msra.mxu2 %v1636_v17 }
  0x24   :  { %738 = vmatpush.msrb.mxu1 %v1642_v20  ;;  %310 = vmatpush.msra.mxu3 %v1659_v24 }
  0x25   :  { %293 = vmatpush.msra.mxu2 %v1640_v19  ;;  %1236 = vmatmul.msk.bf16.vlgmr.msra.gmra.mxu0 %vm167_vm0, %v1260_v16 }
  0x26   :  { %718 = vmatpush.msrb.mxu0 %v1622_v0  ;;  %739 = vmatpush.msrb.mxu1 %v1644_v21 }
  0x27   :  { %294 = vmatpush.msra.mxu2 %v1648_v22  ;;  %311 = vmatpush.msra.mxu3 %v1662_v26 }
  0x28   :  { %295 = vmatmul.f32.vlgmr.msra.gmra.mxu2 %v1547_v25  ;;  %719 = vmatpush.msrb.mxu0 %v1625_v4 }
  0x29   :  { %394 = vmatpush.msrb.mxu2 %v1622_v0  ;;  %740 = vmatpush.msrb.mxu1 %v1653_v23 }
  0x2a   :  { %720 = vmatpush.msrb.mxu0 %v1627_v6  ;;  %312 = vmatpush.msra.mxu3 %v1668_v27 }
  0x2b   :  { %395 = vmatpush.msrb.mxu2 %v1625_v4  ;;  %741 = vmatpush.msrb.mxu1 %v1659_v24 }
  0x2c   :  { %721 = vmatpush.msrb.mxu0 %v1630_v10  ;;  %313 = vmatpush.msra.mxu3 %v1684_v29 }
  0x2d   :  { %396 = vmatpush.msrb.mxu2 %v1627_v6  ;;  %742 = vmatpush.msrb.mxu1 %v1662_v26 }
  0x2e   :  { %722 = vmatpush.msrb.mxu0 %v1633_v15  ;;  %314 = vmatpush.msra.mxu3 %v1686_v30 }
  0x2f   :  { %397 = vmatpush.msrb.mxu2 %v1630_v10  ;;  %743 = vmatpush.msrb.mxu1 %v1668_v27 }
  0x30   :  { %723 = vmatpush.msrb.mxu0 %v1636_v17  ;;  %315 = vmatmul.f32.vlgmr.msra.gmra.mxu3 %v1547_v25 }
  0x31   :  { %398 = vmatpush.msrb.mxu2 %v1633_v15  ;;  %744 = vmatpush.msrb.mxu1 %v1684_v29 }
  0x32   :  { %724 = vmatpush.msrb.mxu0 %v1640_v19  ;;  %414 = vmatpush.msrb.mxu3 %v1642_v20 }
  0x33   :  { %1241 = vmatmul.msk.bf16.gmra.mxu1 %vm167_vm0, %v1261_v28  ;;  %399 = vmatpush.msrb.mxu2 %v1636_v17 }
  0x34   :  { %725 = vmatpush.msrb.mxu0 %v1648_v22  ;;  %415 = vmatpush.msrb.mxu3 %v1644_v21 }
  0x35   :  { %400 = vmatpush.msrb.mxu2 %v1640_v19  ;;  %1237 = vmatmul.msk.bf16.gmra.mxu0 %vm167_vm0, %v1261_v28 }
  0x36   :  { %745 = vmatpush.msrb.mxu1 %v1686_v30  ;;  %930 = vmatpush.msra.mxu0 %v1622_v0 }
  0x37   :  { %401 = vmatpush.msrb.mxu2 %v1648_v22  ;;  %416 = vmatpush.msrb.mxu3 %v1653_v23 }
  0x38   :  { %950 = vmatpush.msra.mxu1 %v1642_v20  ;;  %931 = vmatpush.msra.mxu0 %v1625_v4 }
  0x39   :  { %502 = vmatpush.msra.mxu2 %v1622_v0  ;;  %417 = vmatpush.msrb.mxu3 %v1659_v24 }
  0x3a   :  { %951 = vmatpush.msra.mxu1 %v1644_v21  ;;  %932 = vmatpush.msra.mxu0 %v1627_v6 }
  0x3b   :  { %503 = vmatpush.msra.mxu2 %v1625_v4  ;;  %418 = vmatpush.msrb.mxu3 %v1662_v26 }
  0x3c   :  { %952 = vmatpush.msra.mxu1 %v1653_v23  ;;  %933 = vmatpush.msra.mxu0 %v1630_v10 }
  0x3d   :  { %504 = vmatpush.msra.mxu2 %v1627_v6  ;;  %419 = vmatpush.msrb.mxu3 %v1668_v27 }
  0x3e   :  { %953 = vmatpush.msra.mxu1 %v1659_v24  ;;  %934 = vmatpush.msra.mxu0 %v1633_v15 }
  0x3f   :  { %505 = vmatpush.msra.mxu2 %v1630_v10  ;;  %420 = vmatpush.msrb.mxu3 %v1684_v29 }
  0x40   :  { %954 = vmatpush.msra.mxu1 %v1662_v26  ;;  %935 = vmatpush.msra.mxu0 %v1636_v17 }
  0x41   :  { %506 = vmatpush.msra.mxu2 %v1633_v15  ;;  %421 = vmatpush.msrb.mxu3 %v1686_v30 }
  0x42   :  { %955 = vmatpush.msra.mxu1 %v1668_v27  ;;  %936 = vmatpush.msra.mxu0 %v1640_v19 }
  0x43   :  { %1242 = vmatmul.msk.bf16.gmra.mxu1 %vm167_vm0, %v1262_v31  ;;  %507 = vmatpush.msra.mxu2 %v1636_v17 }
  0x44   :  { %522 = vmatpush.msra.mxu3 %v1642_v20  ;;  %956 = vmatpush.msra.mxu1 %v1684_v29 }
  0x45   :  { %508 = vmatpush.msra.mxu2 %v1640_v19  ;;  %1238 = vmatmul.msk.bf16.gmra.mxu0 %vm167_vm0, %v1262_v31 }
  0x46   :  { %523 = vmatpush.msra.mxu3 %v1644_v21  ;;  %937 = vmatpush.msra.mxu0 %v1648_v22 }
  0x47   :  { %509 = vmatpush.msra.mxu2 %v1648_v22  ;;  %957 = vmatpush.msra.mxu1 %v1686_v30 }
  0x48   :  { %524 = vmatpush.msra.mxu3 %v1653_v23  ;;  %272 = vperm.xlu2 %1283, %v270_v60  }
  0x4a   :  { %525 = vmatpush.msra.mxu3 %v1659_v24 }
  0x4c   :  { %526 = vmatpush.msra.mxu3 %v1662_v26 }
  0x4e   :  { %527 = vmatpush.msra.mxu3 %v1668_v27 }
  0x50   :  { %528 = vmatpush.msra.mxu3 %v1684_v29 }
  0x52   :  { %529 = vmatpush.msra.mxu3 %v1686_v30 }
  0x53   :  { %1243 = vmatmul.msk.bf16.gmra.mxu1 %vm167_vm0, %v1263_v32 }
  0x55   :  { %1239 = vmatmul.msk.bf16.gmra.mxu0 %vm167_vm0, %v1263_v32 }
  0xa0   :  { %v218_v35 = vpop.f32.mrf.mxu1 }
  0xa1   :  { %v1745_v36 = vadd.f32 %v218_v35, %v124_v34 }
  0xa2   :  { %v189_v38 = vpop.f32.mrf.mxu0 }
  0xa3   :  { %v190_v41 = vadd.f32 %v189_v38, %v1747_v37 }
  0xa8   :  { %v220_v39 = vpop.f32.mrf.mxu1 }
  0xa9   :  { %v1749_v40 = vadd.f32 %v220_v39, %v124_v34 }
  0xab   :  { %v296_v42 = vpop.f32.mrf.mxu2 }
  0xac   :  { %v320_v43 = vadd.f32 %v296_v42, %v190_v41 }
  0xae   :  { %1286 = vtanh.f32 %v320_v43  ;;  %v324_v62 = vmul.f32 0.5, %v320_v43 }
  0xb0   :  { %v223_v44 = vpop.f32.mrf.mxu1 }
  0xb1   :  { %v1752_v45 = vadd.f32 %v223_v44, %v124_v34 }
  0xb3   :  { %v316_v56 = vpop.f32.mrf.mxu3 }
  0xb4   :  { %v1287_v46 = vpop.eup %1286 }
  0xb5   :  { %331 = vrot.lane.b32.xlu0 %v1287_v46, %s1541_s23 }
  0xb8   :  { %v225_v47 = vpop.f32.mrf.mxu1 }
  0xb9   :  { %v1755_v48 = vadd.f32 %v225_v47, %v124_v34 }
  0xc0   :  { %v228_v49 = vpop.f32.mrf.mxu1 }
  0xc1   :  { %v1757_v50 = vadd.f32 %v228_v49, %v124_v34 }
  0xc8   :  { %v230_v51 = vpop.f32.mrf.mxu1 }
  0xc9   :  { %v1759_v52 = vadd.f32 %v230_v51, %v124_v34  ;;  %v191_v51 = vpop.f32.mrf.mxu0 }
  0xd0   :  { %v233_v53 = vpop.f32.mrf.mxu1 }
  0xd1   :  { %v1761_v54 = vadd.f32 %v233_v53, %v124_v34  ;;  %v192_v53 = vadd.f32 %v191_v51, %v1747_v37 }
  0xd8   :  { %v235_v55 = vpop.f32.mrf.mxu1 }
  0xd9   :  { %v236_v57 = vadd.f32 %v235_v55, %v124_v34  ;;  %v1777_v34 = vpop.permute.xlu2 %272 }
  0xda   :  { %vm368_vm1 = vcmp.gt.s32.totalorder %v1777_v34, 0  ;;  %v1787_v41 = vsub.s32 8, %v1777_v34  ;;  %vm476_vm4 = vcmp.gt.s32.totalorder %v1777_v34, 1  ;;  %vm584_vm6 = vcmp.gt.s32.totalorder %v1777_v34, 2 }
  0xdb   :  { %v323_v58 = vadd.f32 %v316_v56, %v236_v57  ;;  %vm692_vm8 = vcmp.gt.s32.totalorder %v1777_v34, 3  ;;  %vm798_vm10 = vcmp.gt.s32.totalorder %v1777_v34, 4  ;;  %vm904_vm12 = vcmp.gt.s32.totalorder %v1777_v34, 5 }
  0xdc   :  { %vm369_vm2 = vcmp.le.s32.totalorder %v1787_v41, 0  ;;  %vm477_vm5 = vcmp.le.s32.totalorder %v1787_v41, 1  ;;  %vm585_vm7 = vcmp.le.s32.totalorder %v1787_v41, 2  ;;  %vm693_vm9 = vcmp.le.s32.totalorder %v1787_v41, 3 }
  0xdd   :  { %1288 = vtanh.f32 %v323_v58  ;;  %v346_v7 = vmul.f32 0.5, %v323_v58  ;;  %vm799_vm11 = vcmp.le.s32.totalorder %v1787_v41, 4  ;;  %vm905_vm13 = vcmp.le.s32.totalorder %v1787_v41, 5 }
  0xde   :  { %1290 = vtanh.f32 %v324_v62  ;;  %vm1010_vm14 = vcmp.gt.s32.totalorder %v1777_v34, 6  ;;  %vm1011_vm15 = vcmp.le.s32.totalorder %v1787_v41, 6 }
  0xdf   :  { %1292 = vtanh.f32 %v346_v7 }
  0xe3   :  { %v1289_v59 = vpop.eup %1288 }
  0xe4   :  { %353 = vrot.lane.b32.xlu0 %v1289_v59, %s1541_s23  ;;  %v1291_v63 = vpop.eup %1290 }
  0xe5   :  { %v326_v1 = vadd.f32 1.0, %v1291_v63  ;;  %v1293_v8 = vpop.eup %1292 }
  0xe6   :  { %v348_v9 = vadd.f32 1.0, %v1293_v8 }
  0xe7   :  { %v327_v2 = vmul.f32 0.5, %v326_v1 }
  0xe8   :  { %v349_v11 = vmul.f32 0.5, %v348_v9 }
  0xe9   :  { %v329_v14 = vmul.f32 0.0, %v327_v2 }
  0xea   :  { %v351_v28 = vmul.f32 0.0, %v349_v11 }
 0x127   :  { %v332_v3 = vpop.permute.xlu0 %331 }
 0x128   :  { %v334_v5 = vmul.f32 %v332_v3, %v327_v2 }
 0x12a   :  { %336 = vrot.lane.b32.xlu1 %v334_v5, %s1549_s12 }
 0x156   :  { %v354_v12 = vpop.permute.xlu0 %353 }
 0x157   :  { %v356_v13 = vmul.f32 %v354_v12, %v349_v11 }
 0x159   :  { %358 = vrot.lane.b32.xlu1 %v356_v13, %s1549_s12 }
 0x19c   :  { %v337_v16 = vpop.permute.xlu1 %336 }
 0x19d   :  { %v1769_v18 = vadd.f32 %v337_v16, %v329_v14 }
 0x19f   :  { %1294 = vtanh.f32 %v1769_v18  ;;  %v1824_v12 = vsel %vm368_vm1, %v1769_v18, 0.0 }
 0x1a5   :  { %v1295_v25 = vpop.eup %1294 }
 0x1a6   :  { %342 = vrot.lane.b32.xlu2 %v1295_v25, %s1541_s23 }
 0x1cb   :  { %v359_v31 = vpop.permute.xlu1 %358 }
 0x1cc   :  { %v1773_v32 = vadd.f32 %v359_v31, %v351_v28 }
 0x1ce   :  { %1296 = vtanh.f32 %v1773_v32  ;;  %v1834_v28 = vsel %vm369_vm2, %v1773_v32, 0.0 }
 0x1d4   :  { %v1297_v33 = vpop.eup %1296 }
 0x1d5   :  { %364 = vrot.lane.b32.xlu0 %v1297_v33, %s1541_s23 }
 0x200   :  { %v343_v35 = vpop.permute.xlu2 %342 }
 0x201   :  { %v345_v38 = vmul.f32 %v343_v35, %v327_v2 }
 0x203   :  { %v1782_v39 = vsel %vm368_vm1, %v345_v38, 0.0  ;;  %vm1116_vm1 = vcmp.gt.s32.totalorder %v1777_v34, 7  ;;  %v1285_v34 = vld [vmem:[%s2099_s7] ss:$0 sm:$0xff] }
 0x204   :  { %375 = vrot.lane.b32.xlu1 %v1782_v39, %s1549_s12 }
 0x247   :  { %v365_v42 = vpop.permute.xlu0 %364 }
 0x248   :  { %v367_v43 = vmul.f32 %v365_v42, %v349_v11 }
 0x24a   :  { %v1792_v44 = vsel %vm369_vm2, %v367_v43, 0.0  ;;  %vm1117_vm2 = vcmp.le.s32.totalorder %v1787_v41, 7 }
 0x24b   :  { %379 = vrot.lane.b32.xlu2 %v1792_v44, %s1541_s23 }
 0x276   :  { %v376_v46 = vpop.permute.xlu1 %375 }
 0x2a5   :  { %v380_v47 = vpop.permute.xlu2 %379 }
 0x2a6   :  { %v382_v49 = vsel %vm167_vm0, %v376_v46, %v380_v47 }
 0x2a7   :  { %1244 = vmatmul.msk.f32.vlgmr.msrb.gmra.mxu2 %vm275_vm3, %v382_v49  ;;  %1245 = vmatmul.msk.f32.vlgmr.msrb.gmra.mxu3 %vm275_vm3, %v382_v49 }
 0x2a8   :  { %610 = vmatpush.msrb.mxu2 %v1622_v0  ;;  %630 = vmatpush.msrb.mxu3 %v1642_v20 }
 0x2aa   :  { %611 = vmatpush.msrb.mxu2 %v1625_v4  ;;  %631 = vmatpush.msrb.mxu3 %v1644_v21 }
 0x2ac   :  { %612 = vmatpush.msrb.mxu2 %v1627_v6  ;;  %632 = vmatpush.msrb.mxu3 %v1653_v23 }
 0x2ae   :  { %613 = vmatpush.msrb.mxu2 %v1630_v10  ;;  %633 = vmatpush.msrb.mxu3 %v1659_v24 }
 0x2b0   :  { %614 = vmatpush.msrb.mxu2 %v1633_v15  ;;  %634 = vmatpush.msrb.mxu3 %v1662_v26 }
 0x2b2   :  { %615 = vmatpush.msrb.mxu2 %v1636_v17  ;;  %635 = vmatpush.msrb.mxu3 %v1668_v27 }
 0x2b4   :  { %616 = vmatpush.msrb.mxu2 %v1640_v19  ;;  %636 = vmatpush.msrb.mxu3 %v1684_v29 }
 0x2b6   :  { %617 = vmatpush.msrb.mxu2 %v1648_v22  ;;  %637 = vmatpush.msrb.mxu3 %v1686_v30 }
 0x32a   :  { %v403_v55 = vpop.f32.mrf.mxu2  ;;  %v423_v56 = vpop.f32.mrf.mxu3 }
 0x32b   :  { %v428_v57 = vadd.f32 %v403_v55, %v192_v53  ;;  %v431_v58 = vadd.f32 %v423_v56, %v1761_v54 }
 0x32d   :  { %1298 = vtanh.f32 %v428_v57  ;;  %v432_v61 = vmul.f32 0.5, %v428_v57  ;;  %v454_v62 = vmul.f32 0.5, %v431_v58 }
 0x32e   :  { %1300 = vtanh.f32 %v431_v58 }
 0x32f   :  { %1302 = vtanh.f32 %v432_v61 }
 0x330   :  { %1304 = vtanh.f32 %v454_v62 }
 0x333   :  { %v1299_v59 = vpop.eup %1298 }
 0x334   :  { %v1301_v60 = vpop.eup %1300  ;;  %439 = vrot.lane.b32.xlu0 %v1299_v59, %s1541_s23 }
 0x335   :  { %461 = vrot.lane.b32.xlu1 %v1301_v60, %s1541_s23  ;;  %v1303_v63 = vpop.eup %1302 }
 0x336   :  { %v1305_v1 = vpop.eup %1304  ;;  %v434_v2 = vadd.f32 1.0, %v1303_v63 }
 0x337   :  { %v456_v3 = vadd.f32 1.0, %v1305_v1 }
 0x338   :  { %v435_v5 = vmul.f32 0.5, %v434_v2 }
 0x339   :  { %v457_v7 = vmul.f32 0.5, %v456_v3 }
 0x33a   :  { %v437_v13 = vmul.f32 %v435_v5, %v1824_v12 }
 0x33b   :  { %v459_v31 = vmul.f32 %v457_v7, %v1834_v28 }
 0x3a6   :  { %v440_v8 = vpop.permute.xlu0 %439 }
 0x3a7   :  { %v462_v54 = vpop.permute.xlu1 %461  ;;  %v442_v9 = vmul.f32 %v440_v8, %v435_v5 }
 0x3a8   :  { %v464_v11 = vmul.f32 %v462_v54, %v457_v7 }
 0x3a9   :  { %444 = vrot.lane.b32.xlu2 %v442_v9, %s1549_s12 }
 0x3aa   :  { %466 = vrot.lane.b32.xlu0 %v464_v11, %s1549_s12 }
 0x403   :  { %v445_v14 = vpop.permute.xlu2 %444 }
 0x404   :  { %v1827_v16 = vadd.f32 %v445_v14, %v437_v13 }
 0x406   :  { %1306 = vtanh.f32 %v1827_v16  ;;  %v1886_v11 = vsel %vm476_vm4, %v1827_v16, %v1824_v12 }
 0x40c   :  { %v1307_v25 = vpop.eup %1306 }
 0x40d   :  { %450 = vrot.lane.b32.xlu1 %v1307_v25, %s1541_s23 }
 0x41c   :  { %v467_v33 = vpop.permute.xlu0 %466 }
 0x41d   :  { %v1837_v18 = vadd.f32 %v467_v33, %v459_v31 }
 0x41f   :  { %1308 = vtanh.f32 %v1837_v18  ;;  %v1892_v13 = vsel %vm477_vm5, %v1837_v18, %v1834_v28 }
 0x425   :  { %v1309_v35 = vpop.eup %1308 }
 0x426   :  { %472 = vrot.lane.b32.xlu2 %v1309_v35, %s1541_s23 }
 0x47f   :  { %v451_v38 = vpop.permute.xlu1 %450 }
 0x480   :  { %v473_v42 = vpop.permute.xlu2 %472  ;;  %v453_v43 = vmul.f32 %v451_v38, %v435_v5 }
 0x481   :  { %v475_v46 = vmul.f32 %v473_v42, %v457_v7 }
 0x482   :  { %v1846_v32 = vsel %vm476_vm4, %v453_v43, %v1782_v39  ;;  %v194_v39 = vpop.f32.mrf.mxu0 }
 0x483   :  { %v1851_v47 = vsel %vm477_vm5, %v475_v46, %v1792_v44  ;;  %483 = vrot.lane.b32.xlu0 %v1846_v32, %s1549_s12  ;;  %v195_v44 = vadd.f32 %v194_v39, %v1747_v37 }
 0x484   :  { %487 = vrot.lane.b32.xlu1 %v1851_v47, %s1541_s23 }
 0x4f5   :  { %v484_v49 = vpop.permute.xlu0 %483 }
 0x4f6   :  { %v488_v51 = vpop.permute.xlu1 %487 }
 0x4f7   :  { %v490_v53 = vsel %vm167_vm0, %v484_v49, %v488_v51 }
 0x4f8   :  { %1246 = vmatmul.msk.f32.vlgmr.msra.gmra.mxu2 %vm275_vm3, %v490_v53  ;;  %1247 = vmatmul.msk.f32.vlgmr.msra.gmra.mxu3 %vm275_vm3, %v490_v53 }
 0x4f9   :  { %824 = vmatpush.msra.mxu2 %v1622_v0  ;;  %844 = vmatpush.msra.mxu3 %v1642_v20 }
 0x4fb   :  { %825 = vmatpush.msra.mxu2 %v1625_v4  ;;  %845 = vmatpush.msra.mxu3 %v1644_v21 }
 0x4fd   :  { %826 = vmatpush.msra.mxu2 %v1627_v6  ;;  %846 = vmatpush.msra.mxu3 %v1653_v23 }
 0x4ff   :  { %827 = vmatpush.msra.mxu2 %v1630_v10  ;;  %847 = vmatpush.msra.mxu3 %v1659_v24 }
 0x501   :  { %828 = vmatpush.msra.mxu2 %v1633_v15  ;;  %848 = vmatpush.msra.mxu3 %v1662_v26 }
 0x503   :  { %829 = vmatpush.msra.mxu2 %v1636_v17  ;;  %849 = vmatpush.msra.mxu3 %v1668_v27 }
 0x505   :  { %830 = vmatpush.msra.mxu2 %v1640_v19  ;;  %850 = vmatpush.msra.mxu3 %v1684_v29 }
 0x507   :  { %831 = vmatpush.msra.mxu2 %v1648_v22  ;;  %851 = vmatpush.msra.mxu3 %v1686_v30 }
 0x57b   :  { %v511_v55 = vpop.f32.mrf.mxu2  ;;  %v531_v56 = vpop.f32.mrf.mxu3 }
 0x57c   :  { %v536_v57 = vadd.f32 %v511_v55, %v195_v44  ;;  %v539_v58 = vadd.f32 %v531_v56, %v1759_v52 }
 0x57e   :  { %1310 = vtanh.f32 %v536_v57  ;;  %v540_v61 = vmul.f32 0.5, %v536_v57  ;;  %v562_v5 = vmul.f32 0.5, %v539_v58 }
 0x57f   :  { %1312 = vtanh.f32 %v539_v58 }
 0x580   :  { %1314 = vtanh.f32 %v540_v61 }
 0x581   :  { %1316 = vtanh.f32 %v562_v5 }
 0x584   :  { %v1311_v59 = vpop.eup %1310 }
 0x585   :  { %v1313_v60 = vpop.eup %1312  ;;  %547 = vrot.lane.b32.xlu2 %v1311_v59, %s1541_s23 }
 0x586   :  { %569 = vrot.lane.b32.xlu0 %v1313_v60, %s1541_s23  ;;  %v1315_v62 = vpop.eup %1314 }
 0x587   :  { %v542_v63 = vadd.f32 1.0, %v1315_v62  ;;  %v1317_v52 = vpop.eup %1316 }
 0x588   :  { %v564_v7 = vadd.f32 1.0, %v1317_v52 }
 0x589   :  { %v543_v1 = vmul.f32 0.5, %v542_v63 }
 0x58a   :  { %v565_v8 = vmul.f32 0.5, %v564_v7 }
 0x58b   :  { %v545_v14 = vmul.f32 %v543_v1, %v1886_v11 }
 0x58c   :  { %v567_v25 = vmul.f32 %v565_v8, %v1892_v13 }
 0x5df   :  { %v548_v2 = vpop.permute.xlu2 %547 }
 0x5e0   :  { %v550_v3 = vmul.f32 %v548_v2, %v543_v1 }
 0x5e2   :  { %552 = vrot.lane.b32.xlu1 %v550_v3, %s1549_s12 }
 0x5f8   :  { %v570_v54 = vpop.permute.xlu0 %569 }
 0x5f9   :  { %v572_v9 = vmul.f32 %v570_v54, %v565_v8 }
 0x5fb   :  { %574 = vrot.lane.b32.xlu2 %v572_v9, %s1549_s12 }
 0x654   :  { %v553_v31 = vpop.permute.xlu1 %552 }
 0x655   :  { %v575_v33 = vpop.permute.xlu2 %574  ;;  %v1896_v35 = vadd.f32 %v553_v31, %v545_v14 }
 0x656   :  { %v1898_v38 = vadd.f32 %v575_v33, %v567_v25 }
 0x657   :  { %1318 = vtanh.f32 %v1896_v35  ;;  %v587_v60 = vsel %vm584_vm6, %v1896_v35, %v1886_v11 }
 0x658   :  { %1320 = vtanh.f32 %v1898_v38  ;;  %v1949_v55 = vsel %vm585_vm7, %v1898_v38, %v1892_v13 }
 0x65d   :  { %v1319_v12 = vpop.eup %1318 }
 0x65e   :  { %v1321_v16 = vpop.eup %1320  ;;  %558 = vrot.lane.b32.xlu0 %v1319_v12, %s1541_s23 }
 0x65f   :  { %580 = vrot.lane.b32.xlu1 %v1321_v16, %s1541_s23 }
 0x6d0   :  { %v559_v28 = vpop.permute.xlu0 %558 }
 0x6d1   :  { %v581_v18 = vpop.permute.xlu1 %580  ;;  %v561_v42 = vmul.f32 %v559_v28, %v543_v1 }
 0x6d2   :  { %v583_v43 = vmul.f32 %v581_v18, %v565_v8 }
 0x6d3   :  { %v1909_v46 = vsel %vm584_vm6, %v561_v42, %v1846_v32 }
 0x6d4   :  { %v1914_v49 = vsel %vm585_vm7, %v583_v43, %v1851_v47  ;;  %591 = vrot.lane.b32.xlu2 %v1909_v46, %s1549_s12 }
 0x6d5   :  { %595 = vrot.lane.b32.xlu0 %v1914_v49, %s1541_s23 }
 0x72e   :  { %v592_v51 = vpop.permute.xlu2 %591 }
 0x747   :  { %v596_v53 = vpop.permute.xlu0 %595 }
 0x748   :  { %v598_v39 = vsel %vm167_vm0, %v592_v51, %v596_v53 }
 0x749   :  { %1248 = vmatmul.msk.f32.vlgmr.msrb.gmra.mxu2 %vm275_vm3, %v598_v39  ;;  %1249 = vmatmul.msk.f32.vlgmr.msrb.gmra.mxu3 %vm275_vm3, %v598_v39 }
 0x74a   :  { %1036 = vmatpush.msrb.mxu2 %v1622_v0  ;;  %1056 = vmatpush.msrb.mxu3 %v1642_v20  ;;  %v196_v0 = vpop.f32.mrf.mxu0 }
 0x74c   :  { %1037 = vmatpush.msrb.mxu2 %v1625_v4  ;;  %1057 = vmatpush.msrb.mxu3 %v1644_v21  ;;  %v197_v4 = vadd.f32 %v196_v0, %v1747_v37 }
 0x74e   :  { %1038 = vmatpush.msrb.mxu2 %v1627_v6  ;;  %1058 = vmatpush.msrb.mxu3 %v1653_v23 }
 0x750   :  { %1039 = vmatpush.msrb.mxu2 %v1630_v10  ;;  %1059 = vmatpush.msrb.mxu3 %v1659_v24 }
 0x752   :  { %1040 = vmatpush.msrb.mxu2 %v1633_v15  ;;  %1060 = vmatpush.msrb.mxu3 %v1662_v26  ;;  %v199_v13 = vpop.f32.mrf.mxu0 }
 0x753   :  { %v200_v33 = vadd.f32 %v199_v13, %v1747_v37 }
 0x754   :  { %1041 = vmatpush.msrb.mxu2 %v1636_v17  ;;  %1061 = vmatpush.msrb.mxu3 %v1668_v27 }
 0x756   :  { %1042 = vmatpush.msrb.mxu2 %v1640_v19  ;;  %1062 = vmatpush.msrb.mxu3 %v1684_v29 }
 0x758   :  { %1043 = vmatpush.msrb.mxu2 %v1648_v22  ;;  %1063 = vmatpush.msrb.mxu3 %v1686_v30 }
 0x75a   :  { %v201_v14 = vpop.f32.mrf.mxu0 }
 0x762   :  { %v1974_v25 = vpop.f32.mrf.mxu0 }
 0x76a   :  { %v1976_v31 = vpop.f32.mrf.mxu0 }
 0x7cc   :  { %v619_v6 = vpop.f32.mrf.mxu2  ;;  %v639_v10 = vpop.f32.mrf.mxu3 }
 0x7cd   :  { %v644_v15 = vadd.f32 %v619_v6, %v197_v4  ;;  %v647_v20 = vadd.f32 %v639_v10, %v1757_v50 }
 0x7cf   :  { %1322 = vtanh.f32 %v644_v15  ;;  %v670_v19 = vmul.f32 0.5, %v647_v20  ;;  %v648_v29 = vmul.f32 0.5, %v644_v15 }
 0x7d0   :  { %1324 = vtanh.f32 %v647_v20 }
 0x7d1   :  { %1326 = vtanh.f32 %v670_v19 }
 0x7d2   :  { %1328 = vtanh.f32 %v648_v29 }
 0x7d5   :  { %v1323_v17 = vpop.eup %1322 }
 0x7d6   :  { %v1325_v21 = vpop.eup %1324  ;;  %655 = vrot.lane.b32.xlu1 %v1323_v17, %s1541_s23 }
 0x7d7   :  { %677 = vrot.lane.b32.xlu2 %v1325_v21, %s1541_s23  ;;  %v1327_v22 = vpop.eup %1326 }
 0x7d8   :  { %v672_v23 = vadd.f32 1.0, %v1327_v22  ;;  %v1329_v30 = vpop.eup %1328 }
 0x7d9   :  { %v650_v50 = vadd.f32 1.0, %v1329_v30 }
 0x7da   :  { %v673_v24 = vmul.f32 0.5, %v672_v23 }
 0x7db   :  { %v651_v32 = vmul.f32 0.5, %v650_v50 }
 0x7dc   :  { %v675_v56 = vmul.f32 %v673_v24, %v1949_v55 }
 0x7dd   :  { %v653_v61 = vmul.f32 %v651_v32, %v587_v60 }
 0x831   :  { %v678_v26 = vpop.permute.xlu2 %677 }
 0x832   :  { %v680_v27 = vmul.f32 %v678_v26, %v673_v24 }
 0x834   :  { %682 = vrot.lane.b32.xlu1 %v680_v27, %s1549_s12 }
 0x848   :  { %v656_v47 = vpop.permute.xlu1 %655 }
 0x849   :  { %v658_v44 = vmul.f32 %v656_v47, %v651_v32 }
 0x84b   :  { %660 = vrot.lane.b32.xlu0 %v658_v44, %s1549_s12 }
 0x8a6   :  { %v683_v57 = vpop.permute.xlu1 %682 }
 0x8a7   :  { %v1952_v58 = vadd.f32 %v683_v57, %v675_v56 }
 0x8a9   :  { %1330 = vtanh.f32 %v1952_v58  ;;  %v697_v22 = vsel %vm693_vm9, %v1952_v58, %v1949_v55  ;;  %v202_v58 = vadd.f32 %v201_v14, %v1747_v37 }
 0x8af   :  { %v1331_v59 = vpop.eup %1330 }
 0x8b0   :  { %688 = vrot.lane.b32.xlu0 %v1331_v59, %s1541_s23 }
 0x8bd   :  { %v661_v62 = vpop.permute.xlu0 %660 }
 0x8be   :  { %v663_v63 = vadd.f32 %v661_v62, %v653_v61 }
 0x8c0   :  { %1332 = vtanh.f32 %v663_v63  ;;  %v695_v15 = vsel %vm692_vm8, %v663_v63, %v587_v60 }
 0x8c6   :  { %v1333_v1 = vpop.eup %1332 }
 0x8c7   :  { %666 = vrot.lane.b32.xlu2 %v1333_v1, %s1541_s23 }
 0x921   :  { %v667_v2 = vpop.permute.xlu2 %666 }
 0x922   :  { %v689_v3 = vpop.permute.xlu0 %688  ;;  %v669_v5 = vmul.f32 %v667_v2, %v651_v32 }
 0x923   :  { %v691_v52 = vmul.f32 %v689_v3, %v673_v24 }
 0x924   :  { %v694_v7 = vsel %vm692_vm8, %v669_v5, %v1909_v46 }
 0x925   :  { %v696_v8 = vsel %vm693_vm9, %v691_v52, %v1914_v49  ;;  %699 = vrot.lane.b32.xlu1 %v694_v7, %s1549_s12 }
 0x926   :  { %703 = vrot.lane.b32.xlu2 %v696_v8, %s1541_s23 }
 0x980   :  { %v704_v54 = vpop.permute.xlu2 %703 }
 0x997   :  { %v700_v9 = vpop.permute.xlu1 %699 }
 0x998   :  { %v706_v11 = vsel %vm167_vm0, %v700_v9, %v704_v54 }
 0x999   :  { %1250 = vmatmul.msk.f32.vlgmr.msrb.gmra.mxu0 %vm275_vm3, %v706_v11  ;;  %1251 = vmatmul.msk.f32.vlgmr.msrb.gmra.mxu1 %vm275_vm3, %v706_v11 }
 0xa16   :  { %v727_v35 = vpop.f32.mrf.mxu0  ;;  %v747_v38 = vpop.f32.mrf.mxu1 }
 0xa17   :  { %v751_v12 = vadd.f32 %v727_v35, %v200_v33  ;;  %v753_v16 = vadd.f32 %v747_v38, %v1755_v48 }
 0xa19   :  { %1334 = vtanh.f32 %v751_v12  ;;  %v754_v42 = vmul.f32 0.5, %v751_v12  ;;  %v776_v43 = vmul.f32 0.5, %v753_v16 }
 0xa1a   :  { %1336 = vtanh.f32 %v753_v16 }
 0xa1b   :  { %1338 = vtanh.f32 %v754_v42 }
 0xa1c   :  { %1340 = vtanh.f32 %v776_v43 }
 0xa1f   :  { %v1335_v28 = vpop.eup %1334 }
 0xa20   :  { %v1337_v18 = vpop.eup %1336  ;;  %761 = vrot.lane.b32.xlu0 %v1335_v28, %s1541_s23 }
 0xa21   :  { %783 = vrot.lane.b32.xlu1 %v1337_v18, %s1541_s23  ;;  %v1339_v46 = vpop.eup %1338 }
 0xa22   :  { %v1341_v49 = vpop.eup %1340  ;;  %v756_v51 = vadd.f32 1.0, %v1339_v46 }
 0xa23   :  { %v778_v53 = vadd.f32 1.0, %v1341_v49 }
 0xa24   :  { %v757_v39 = vmul.f32 0.5, %v756_v51 }
 0xa25   :  { %v779_v0 = vmul.f32 0.5, %v778_v53 }
 0xa26   :  { %v759_v20 = vmul.f32 %v757_v39, %v695_v15 }
 0xa27   :  { %v781_v23 = vmul.f32 %v779_v0, %v697_v22 }
 0xa92   :  { %v762_v4 = vpop.permute.xlu0 %761 }
 0xa93   :  { %v784_v48 = vpop.permute.xlu1 %783  ;;  %v764_v6 = vmul.f32 %v762_v4, %v757_v39 }
 0xa94   :  { %v786_v10 = vmul.f32 %v784_v48, %v779_v0 }
 0xa95   :  { %766 = vrot.lane.b32.xlu2 %v764_v6, %s1549_s12 }
 0xa96   :  { %788 = vrot.lane.b32.xlu0 %v786_v10, %s1549_s12 }
 0xaef   :  { %v767_v17 = vpop.permute.xlu2 %766 }
 0xaf0   :  { %v769_v21 = vadd.f32 %v767_v17, %v759_v20 }
 0xaf2   :  { %1342 = vtanh.f32 %v769_v21  ;;  %v2011_v33 = vsel %vm798_vm10, %v769_v21, %v695_v15  ;;  %v205_v15 = vadd.f32 %v1974_v25, %v1747_v37 }
 0xaf8   :  { %v1343_v19 = vpop.eup %1342 }
 0xaf9   :  { %772 = vrot.lane.b32.xlu1 %v1343_v19, %s1541_s23 }
 0xb08   :  { %v789_v24 = vpop.permute.xlu0 %788 }
 0xb09   :  { %v791_v26 = vadd.f32 %v789_v24, %v781_v23 }
 0xb0b   :  { %1344 = vtanh.f32 %v791_v26  ;;  %v803_v35 = vsel %vm799_vm11, %v791_v26, %v697_v22 }
 0xb11   :  { %v1345_v27 = vpop.eup %1344 }
 0xb12   :  { %794 = vrot.lane.b32.xlu2 %v1345_v27, %s1541_s23 }
 0xb6b   :  { %v773_v29 = vpop.permute.xlu1 %772 }
 0xb6c   :  { %v795_v30 = vpop.permute.xlu2 %794  ;;  %v775_v50 = vmul.f32 %v773_v29, %v757_v39 }
 0xb6d   :  { %v797_v32 = vmul.f32 %v795_v30, %v779_v0 }
 0xb6e   :  { %v800_v47 = vsel %vm798_vm10, %v775_v50, %v694_v7 }
 0xb6f   :  { %v802_v44 = vsel %vm799_vm11, %v797_v32, %v696_v8  ;;  %805 = vrot.lane.b32.xlu0 %v800_v47, %s1549_s12 }
 0xb70   :  { %809 = vrot.lane.b32.xlu1 %v802_v44, %s1541_s23 }
 0xbe1   :  { %v806_v55 = vpop.permute.xlu0 %805 }
 0xbe2   :  { %v810_v56 = vpop.permute.xlu1 %809 }
 0xbe3   :  { %v812_v57 = vsel %vm167_vm0, %v806_v55, %v810_v56 }
 0xbe4   :  { %1252 = vmatmul.msk.f32.vlgmr.msra.gmra.mxu2 %vm275_vm3, %v812_v57  ;;  %1253 = vmatmul.msk.f32.vlgmr.msra.gmra.mxu3 %vm275_vm3, %v812_v57 }
 0xc67   :  { %v833_v59 = vpop.f32.mrf.mxu2  ;;  %v853_v60 = vpop.f32.mrf.mxu3 }
 0xc68   :  { %v857_v61 = vadd.f32 %v833_v59, %v202_v58  ;;  %v859_v62 = vadd.f32 %v853_v60, %v1752_v45 }
 0xc6a   :  { %1346 = vtanh.f32 %v857_v61  ;;  %v860_v2 = vmul.f32 0.5, %v857_v61  ;;  %v882_v54 = vmul.f32 0.5, %v859_v62 }
 0xc6b   :  { %1348 = vtanh.f32 %v859_v62 }
 0xc6c   :  { %1350 = vtanh.f32 %v860_v2 }
 0xc6d   :  { %1352 = vtanh.f32 %v882_v54 }
 0xc70   :  { %v1347_v63 = vpop.eup %1346 }
 0xc71   :  { %v1349_v1 = vpop.eup %1348  ;;  %867 = vrot.lane.b32.xlu2 %v1347_v63, %s1541_s23 }
 0xc72   :  { %889 = vrot.lane.b32.xlu0 %v1349_v1, %s1541_s23  ;;  %v1351_v3 = vpop.eup %1350 }
 0xc73   :  { %v862_v5 = vadd.f32 1.0, %v1351_v3  ;;  %v1353_v45 = vpop.eup %1352 }
 0xc74   :  { %v884_v9 = vadd.f32 1.0, %v1353_v45 }
 0xc75   :  { %v863_v52 = vmul.f32 0.5, %v862_v5 }
 0xc76   :  { %v885_v11 = vmul.f32 0.5, %v884_v9 }
 0xc77   :  { %v865_v38 = vmul.f32 %v863_v52, %v2011_v33 }
 0xc78   :  { %v887_v12 = vmul.f32 %v885_v11, %v803_v35 }
 0xccb   :  { %v868_v7 = vpop.permute.xlu2 %867 }
 0xccc   :  { %v870_v8 = vmul.f32 %v868_v7, %v863_v52 }
 0xcce   :  { %872 = vrot.lane.b32.xlu1 %v870_v8, %s1549_s12 }
 0xce4   :  { %v890_v13 = vpop.permute.xlu0 %889 }
 0xce5   :  { %v892_v14 = vmul.f32 %v890_v13, %v885_v11  ;;  %v207_v13 = vadd.f32 %v1976_v31, %v1747_v37 }
 0xce7   :  { %894 = vrot.lane.b32.xlu2 %v892_v14, %s1549_s12 }
 0xd40   :  { %v873_v16 = vpop.permute.xlu1 %872 }
 0xd41   :  { %v895_v28 = vpop.permute.xlu2 %894  ;;  %v875_v18 = vadd.f32 %v873_v16, %v865_v38 }
 0xd42   :  { %v897_v42 = vadd.f32 %v895_v28, %v887_v12 }
 0xd43   :  { %1354 = vtanh.f32 %v875_v18  ;;  %v907_v61 = vsel %vm904_vm12, %v875_v18, %v2011_v33 }
 0xd44   :  { %1356 = vtanh.f32 %v897_v42  ;;  %v2038_v56 = vsel %vm905_vm13, %v897_v42, %v803_v35 }
 0xd49   :  { %v1355_v43 = vpop.eup %1354 }
 0xd4a   :  { %v1357_v46 = vpop.eup %1356  ;;  %878 = vrot.lane.b32.xlu0 %v1355_v43, %s1541_s23 }
 0xd4b   :  { %900 = vrot.lane.b32.xlu1 %v1357_v46, %s1541_s23 }
 0xdbc   :  { %v879_v49 = vpop.permute.xlu0 %878 }
 0xdbd   :  { %v901_v51 = vpop.permute.xlu1 %900  ;;  %v881_v53 = vmul.f32 %v879_v49, %v863_v52 }
 0xdbe   :  { %v903_v39 = vmul.f32 %v901_v51, %v885_v11 }
 0xdbf   :  { %v906_v0 = vsel %vm904_vm12, %v881_v53, %v800_v47 }
 0xdc0   :  { %v908_v4 = vsel %vm905_vm13, %v903_v39, %v802_v44  ;;  %911 = vrot.lane.b32.xlu2 %v906_v0, %s1549_s12 }
 0xdc1   :  { %915 = vrot.lane.b32.xlu0 %v908_v4, %s1541_s23 }
 0xe1a   :  { %v912_v48 = vpop.permute.xlu2 %911 }
 0xe33   :  { %v916_v6 = vpop.permute.xlu0 %915 }
 0xe34   :  { %v918_v10 = vsel %vm167_vm0, %v912_v48, %v916_v6 }
 0xe35   :  { %1254 = vmatmul.msk.f32.vlgmr.msra.gmra.mxu0 %vm275_vm3, %v918_v10  ;;  %1255 = vmatmul.msk.f32.vlgmr.msra.gmra.mxu1 %vm275_vm3, %v918_v10 }
 0xeb2   :  { %v939_v20 = vpop.f32.mrf.mxu0  ;;  %v959_v17 = vpop.f32.mrf.mxu1 }
 0xeb3   :  { %v963_v21 = vadd.f32 %v939_v20, %v205_v15  ;;  %v965_v19 = vadd.f32 %v959_v17, %v1749_v40 }
 0xeb5   :  { %1358 = vtanh.f32 %v963_v21  ;;  %v988_v24 = vmul.f32 0.5, %v965_v19  ;;  %v966_v50 = vmul.f32 0.5, %v963_v21 }
 0xeb6   :  { %1360 = vtanh.f32 %v965_v19 }
 0xeb7   :  { %1362 = vtanh.f32 %v988_v24  ;;  %v1126_v24 = vld [vmem:[#allocation11 + $0x10] sm:$0xff] }
 0xeb8   :  { %1364 = vtanh.f32 %v966_v50 }
 0xebb   :  { %v1359_v22 = vpop.eup %1358 }
 0xebc   :  { %v1361_v23 = vpop.eup %1360  ;;  %973 = vrot.lane.b32.xlu1 %v1359_v22, %s1541_s23  ;;  %v1127_v22 = vld [vmem:[#allocation11 + $0x18] sm:$0xff] }
 0xebd   :  { %995 = vrot.lane.b32.xlu2 %v1361_v23, %s1541_s23  ;;  %v1363_v26 = vpop.eup %1362  ;;  %v1123_v23 = vld [vmem:[#allocation9 + $0x18] sm:$0xff]  ;;  %1145 = vmatpush.msrb.mxu0 %v1127_v22 }
 0xebe   :  { %v990_v27 = vadd.f32 1.0, %v1363_v26  ;;  %v1365_v40 = vpop.eup %1364  ;;  %1170 = vmatpush.msrb.mxu1 %v1123_v23  ;;  %v1122_v26 = vld [vmem:[#allocation9 + $0x10] sm:$0xff] }
 0xebf   :  { %v968_v32 = vadd.f32 1.0, %v1365_v40  ;;  %1146 = vmatpush.msrb.mxu0 %v1126_v24 }
 0xec0   :  { %v991_v29 = vmul.f32 0.5, %v990_v27  ;;  %v1125_v27 = vld [vmem:[#allocation11 + $0x8] sm:$0xff]  ;;  %1171 = vmatpush.msrb.mxu1 %v1122_v26 }
 0xec1   :  { %v969_v47 = vmul.f32 0.5, %v968_v32  ;;  %1147 = vmatpush.msrb.mxu0 %v1125_v27 }
 0xec2   :  { %v993_v57 = vmul.f32 %v991_v29, %v2038_v56 }
 0xec3   :  { %v971_v62 = vmul.f32 %v969_v47, %v907_v61 }
 0xf17   :  { %v996_v30 = vpop.permute.xlu2 %995 }
 0xf18   :  { %v998_v25 = vmul.f32 %v996_v30, %v991_v29  ;;  %v1124_v30 = vld [vmem:[#allocation11] sm:$0xff] }
 0xf19   :  { %1148 = vmatpush.msrb.mxu0 %v1124_v30 }
 0xf1a   :  { %1000 = vrot.lane.b32.xlu1 %v998_v25, %s1549_s12  ;;  %v1120_v25 = vld [vmem:[#allocation9] sm:$0xff] }
 0xf2e   :  { %v974_v44 = vpop.permute.xlu1 %973 }
 0xf2f   :  { %v976_v55 = vmul.f32 %v974_v44, %v969_v47 }
 0xf31   :  { %978 = vrot.lane.b32.xlu0 %v976_v55, %s1549_s12 }
 0xf8c   :  { %v1001_v58 = vpop.permute.xlu1 %1000 }
 0xf8d   :  { %v1003_v59 = vadd.f32 %v1001_v58, %v993_v57 }
 0xf8f   :  { %1366 = vtanh.f32 %v1003_v59  ;;  %v1015_v15 = vsel %vm1011_vm15, %v1003_v59, %v2038_v56 }
 0xf95   :  { %v1367_v60 = vpop.eup %1366 }
 0xf96   :  { %1006 = vrot.lane.b32.xlu0 %v1367_v60, %s1541_s23 }
 0xfa3   :  { %v979_v63 = vpop.permute.xlu0 %978 }
 0xfa4   :  { %v981_v1 = vadd.f32 %v979_v63, %v971_v62 }
 0xfa6   :  { %1368 = vtanh.f32 %v981_v1 }
 0xfac   :  { %v1369_v2 = vpop.eup %1368 }
 0xfad   :  { %984 = vrot.lane.b32.xlu2 %v1369_v2, %s1541_s23 }
0x1007   :  { %v985_v3 = vpop.permute.xlu2 %984 }
0x1008   :  { %v1007_v5 = vpop.permute.xlu0 %1006  ;;  %v987_v52 = vmul.f32 %v985_v3, %v969_v47 }
0x1009   :  { %v1009_v7 = vmul.f32 %v1007_v5, %v991_v29  ;;  %v1121_v29 = vld [vmem:[#allocation9 + $0x8] sm:$0xff] }
0x100a   :  { %v2050_v8 = vsel %vm1010_vm14, %v987_v52, %v906_v0  ;;  %v1013_v0 = vsel %vm1010_vm14, %v981_v1, %v907_v61  ;;  %1172 = vmatpush.msrb.mxu1 %v1121_v29 }
0x100b   :  { %v2054_v54 = vsel %vm1011_vm15, %v1009_v7, %v908_v4  ;;  %1017 = vrot.lane.b32.xlu1 %v2050_v8, %s1549_s12 }
0x100c   :  { %1021 = vrot.lane.b32.xlu2 %v2054_v54, %s1541_s23  ;;  %1173 = vmatpush.msrb.mxu1 %v1120_v25 }
0x1066   :  { %v1022_v45 = vpop.permute.xlu2 %1021 }
0x107d   :  { %v1018_v9 = vpop.permute.xlu1 %1017 }
0x107e   :  { %v1024_v11 = vsel %vm167_vm0, %v1018_v9, %v1022_v45 }
0x107f   :  { %1256 = vmatmul.msk.f32.vlgmr.msrb.gmra.mxu2 %vm275_vm3, %v1024_v11  ;;  %1257 = vmatmul.msk.f32.vlgmr.msrb.gmra.mxu3 %vm275_vm3, %v1024_v11 }
0x1102   :  { %v1045_v14 = vpop.f32.mrf.mxu2  ;;  %v1065_v33 = vpop.f32.mrf.mxu3 }
0x1103   :  { %v1069_v35 = vadd.f32 %v1045_v14, %v207_v13  ;;  %v1071_v38 = vadd.f32 %v1065_v33, %v1745_v36 }
0x1105   :  { %1370 = vtanh.f32 %v1069_v35  ;;  %v1072_v28 = vmul.f32 0.5, %v1069_v35  ;;  %v1094_v18 = vmul.f32 0.5, %v1071_v38 }
0x1106   :  { %1372 = vtanh.f32 %v1071_v38 }
0x1107   :  { %1374 = vtanh.f32 %v1072_v28 }
0x1108   :  { %1376 = vtanh.f32 %v1094_v18 }
0x110b   :  { %v1371_v12 = vpop.eup %1370 }
0x110c   :  { %v1373_v16 = vpop.eup %1372  ;;  %1079 = vrot.lane.b32.xlu0 %v1371_v12, %s1541_s23 }
0x110d   :  { %1101 = vrot.lane.b32.xlu1 %v1373_v16, %s1541_s23  ;;  %v1375_v42 = vpop.eup %1374 }
0x110e   :  { %v1377_v43 = vpop.eup %1376  ;;  %v1074_v37 = vadd.f32 1.0, %v1375_v42 }
0x110f   :  { %v1096_v31 = vadd.f32 1.0, %v1377_v43 }
0x1110   :  { %v1075_v46 = vmul.f32 0.5, %v1074_v37 }
0x1111   :  { %v1097_v49 = vmul.f32 0.5, %v1096_v31 }
0x1112   :  { %v1077_v4 = vmul.f32 %v1075_v46, %v1013_v0 }
0x1113   :  { %v1099_v20 = vmul.f32 %v1097_v49, %v1015_v15 }
0x117e   :  { %v1080_v51 = vpop.permute.xlu0 %1079 }
0x117f   :  { %v1102_v36 = vpop.permute.xlu1 %1101  ;;  %v1082_v53 = vmul.f32 %v1080_v51, %v1075_v46 }
0x1180   :  { %v1104_v39 = vmul.f32 %v1102_v36, %v1097_v49 }
0x1181   :  { %1084 = vrot.lane.b32.xlu2 %v1082_v53, %s1549_s12 }
0x1182   :  { %1106 = vrot.lane.b32.xlu0 %v1104_v39, %s1549_s12 }
0x11db   :  { %v1085_v48 = vpop.permute.xlu2 %1084 }
0x11dc   :  { %v1087_v6 = vadd.f32 %v1085_v48, %v1077_v4 }
0x11de   :  { %1378 = vtanh.f32 %v1087_v6 }
0x11e4   :  { %v1379_v10 = vpop.eup %1378 }
0x11e5   :  { %1090 = vrot.lane.b32.xlu1 %v1379_v10, %s1541_s23 }
0x11f4   :  { %v1107_v17 = vpop.permute.xlu0 %1106 }
0x11f5   :  { %v1109_v21 = vadd.f32 %v1107_v17, %v1099_v20 }
0x11f7   :  { %1380 = vtanh.f32 %v1109_v21 }
0x11fd   :  { %v1381_v19 = vpop.eup %1380 }
0x11fe   :  { %1112 = vrot.lane.b32.xlu2 %v1381_v19, %s1541_s23 }
0x1257   :  { %v1091_v50 = vpop.permute.xlu1 %1090 }
0x1258   :  { %v1113_v40 = vpop.permute.xlu2 %1112  ;;  %v1093_v32 = vmul.f32 %v1091_v50, %v1075_v46 }
0x1259   :  { %v1115_v47 = vmul.f32 %v1113_v40, %v1097_v49 }
0x125a   :  { %v1118_v44 = vsel %vm1116_vm1, %v1093_v32, %v2050_v8 }
0x125b   :  { %v1119_v55 = vsel %vm1117_vm2, %v1115_v47, %v2054_v54  ;;  %1154 = vrot.lane.b32.xlu1 %v1118_v44, %s1549_s12 }
0x125c   :  { %1129 = vrot.lane.b32.xlu0 %v1119_v55, %s1549_s12 }
0x12cd   :  { %v1155_v56 = vpop.permute.xlu1 %1154 }
0x12ce   :  { %v1130_v57 = vpop.permute.xlu0 %1129  ;;  %1259 = vmatmul.msk.f32.vlgmr.msrb.gmra.mxu1 %vm167_vm0, %v1155_v56 }
0x12cf   :  { %1258 = vmatmul.msk.f32.vlgmr.msrb.gmra.mxu0 %vm167_vm0, %v1130_v57 }
0x134b   :  { %v1175_v58 = vpop.f32.mrf.mxu1 }
0x134c   :  { %v1150_v41 = vpop.f32.mrf.mxu0 }
0x134d   :  { %v1176_v59 = vadd.f32 %v1175_v58, %v1150_v41 }
0x134f   :  { %v1182_v60 = vadd.f32 %v1285_v34, %v1176_v59 }
0x1351   :  { %1382 = vtanh.f32 %v1182_v60 }
0x1357   :  { %v1383_v61 = vpop.eup %1382 }
0x1358   :  { %1184 = vst.msk [vmem:[#allocation12] sm:$0xff] %vm275_vm3, %v1383_v61 }
0x1359   :  { %1195 = dma.vmem_to_hbm [thread:$0]  %s1191_s15, 128, %s1193_s2, [#allocation5]  }
0x135a   :  { %1534 = dma.done.wait [#allocation5], 128  }
0x135b   :  { %1535 = vsyncadd [#allocation5], 4294967168 }
0x135c   :  { %1200 = vsyncpa [#allocation4], 1 }
0x135d   :  { %1201 = vsyncpa [#allocation7], 1 }
0x135e   :  { %1202 = vsyncpa [#allocation10], 1 }
0x135f   :  { %1203 = vsyncpa [#allocation5], 1 }

</bundles_post_ra>
